<compile_context>
chip_gen: v7x
topology: tpu7x:2x2x1
jax: 0.10.0
libtpu: 0.0.40
codegen_flags: <defaults>
</compile_context>

<pallas_src>
import functools

import jax
import jax.numpy as jnp
import numpy as np
from jax import lax
from jax.experimental import pallas as pl
from jax.experimental.pallas import tpu as pltpu

BN_EPS = 1e-3
LANE = 128  # TPU lane width: channel dims are padded to multiples of this.


def _round_up(n, m):
    return -(-n // m) * m


def _fold_bn(gamma, beta, mean, var):
    scale = gamma / jnp.sqrt(var + BN_EPS)
    shift = beta - mean * scale
    return scale, shift


# --------------------------------------------------------------------------- #
# Pallas kernel: MaskedConv1d + folded BN (+ fused 1x1 residual conv+BN) (+ReLU)
# --------------------------------------------------------------------------- #
def _conv_bn_kernel(lengths_ref, *refs, kernel_size, pad, halo, time_tile,
                    apply_relu, fuse_residual):
    """One (batch, time-tile) grid step.

    Inputs (after the scalar-prefetched lengths, SMEM (B,) int32), all bf16
    unless noted, all auto-pipelined by BlockSpec:
      x_c   : (1, tT, Cin_p)      center tile of the activation
      [pad>0] x_l, x_r : (1, halo, Cin_p)  left / right halo blocks (clamped
              at sequence edges; invalid rows are zeroed by the row predicate)
      w     : (K, Cin_p, Cout_p)  conv weight with BN scale folded in
      shift : (1, Cout_p) f32     folded BatchNorm shift
      [fuse_residual] xr (1, tT, Cin0_p), wr (Cin0_p, Cout_p),
                      rshift (1, Cout_p) f32
    Output:
      out   : (1, tT, Cout_p) bf16
    Scratch:
      x_win : (tT + 2*halo, Cin_p) bf16 VMEM window (center + halos, masked)
    """
    idx = 0
    x_c = refs[idx]; idx += 1
    if halo > 0:
        x_l, x_r = refs[idx], refs[idx + 1]; idx += 2
    w_ref, shift_ref = refs[idx], refs[idx + 1]; idx += 2
    if fuse_residual:
        xr_ref, wr_ref, rshift_ref = refs[idx], refs[idx + 1], refs[idx + 2]
        idx += 3
    out_ref, x_win = refs[idx], refs[idx + 1]

    b = pl.program_id(0)
    t = pl.program_id(1)
    tT = time_tile
    K = kernel_size
    t0 = t * tT
    seq_len = lengths_ref[b]

    # ---- assemble the masked bf16 window: keep iff 0 <= global_row < seq_len.
    # This single predicate implements both the MaskedConv1d length mask and
    # the conv's 'same' zero padding at the sequence edges (lengths <= T).
    row_c = lax.broadcasted_iota(jnp.int32, (tT, 1), 0) + t0
    keep_c = row_c < seq_len
    x_win[halo:halo + tT, :] = jnp.where(keep_c, x_c[0], 0.0)
    if halo > 0:
        row_l = lax.broadcasted_iota(jnp.int32, (halo, 1), 0) + (t0 - halo)
        keep_l = (row_l >= 0) & (row_l < seq_len)
        x_win[0:halo, :] = jnp.where(keep_l, x_l[0], 0.0)
        row_r = lax.broadcasted_iota(jnp.int32, (halo, 1), 0) + (t0 + tT)
        keep_r = row_r < seq_len
        x_win[halo + tT:, :] = jnp.where(keep_r, x_r[0], 0.0)

    # ---- conv as K accumulating bf16 MXU dots (BN scale already in weights) --
    cout_p = w_ref.shape[2]
    acc = jnp.zeros((tT, cout_p), jnp.float32)
    for k in range(K):                       # static, unrolled
        off = halo - pad + k
        acc = acc + jnp.dot(x_win[off:off + tT, :], w_ref[k],
                            preferred_element_type=jnp.float32)
    y = acc + shift_ref[0]                   # folded BatchNorm1d shift (eval)

    # ---- fused residual branch: masked 1x1 conv + BN + add -------------------
    if fuse_residual:
        xr = jnp.where(keep_c, xr_ref[0], 0.0)
        y = y + jnp.dot(xr, wr_ref[...],
                        preferred_element_type=jnp.float32) + rshift_ref[0]

    if apply_relu:
        y = jnp.maximum(y, 0.0)
    out_ref[0] = y.astype(out_ref.dtype)     # bf16 HBM intermediate


# --------------------------------------------------------------------------- #
# Wrapper around pallas_call
# --------------------------------------------------------------------------- #
def masked_conv_bn(x, lengths, layer, *, kernel_size, pad, halo, time_tile,
                   apply_relu, res=None):
    """x: (B, T_pad, Cin_p) bf16, lengths: (B,) int32, layer: packed params.

    res (optional) fuses the 1x1 residual conv + BN + add into this call:
      {"x": (B, T_pad, Cin0_p) bf16, "w": (Cin0_p, Cout_p) bf16 (scale folded),
       "shift": (1, Cout_p) f32}.
    """
    B, T_pad, cin_p = x.shape
    K = kernel_size
    kw, cin_w, cout_p = layer["w"].shape
    assert kw == K and cin_w == cin_p
    tT = time_tile
    assert T_pad % tT == 0
    if pad > 0:
        assert halo >= pad and halo % 8 == 0 and tT % halo == 0
    nt = T_pad // tT
    fuse = res is not None

    # Center tile + (clamped) halo blocks: three pipelined views of the same
    # array, so no manual DMA and no wrapper-side time padding per layer.
    in_specs = [pl.BlockSpec((1, tT, cin_p), lambda b, t, lens: (b, t, 0))]
    inputs = [x]
    if halo > 0:
        r = tT // halo                 # halo-sized blocks per time tile
        nblk_h = T_pad // halo
        in_specs += [
            pl.BlockSpec((1, halo, cin_p),
                         lambda b, t, lens: (b, jnp.maximum(t * r - 1, 0), 0)),
            pl.BlockSpec((1, halo, cin_p),
                         lambda b, t, lens: (b, jnp.minimum((t + 1) * r,
                                                            nblk_h - 1), 0)),
        ]
        inputs += [x, x]

    # Weight / shift: constant index map -> DMA'd once and kept resident.
    # (On v7x with big real-model weights, pipeline_mode=pl.Buffered(1) here
    #  would halve their resident footprint at zero perf cost.)
    in_specs += [
        pl.BlockSpec((K, cin_p, cout_p), lambda b, t, lens: (0, 0, 0)),
        pl.BlockSpec((1, cout_p), lambda b, t, lens: (0, 0)),
    ]
    inputs += [layer["w"], layer["shift"]]

    if fuse:
        cin0_p = res["x"].shape[2]
        in_specs += [
            pl.BlockSpec((1, tT, cin0_p), lambda b, t, lens: (b, t, 0)),
            pl.BlockSpec((cin0_p, cout_p), lambda b, t, lens: (0, 0)),
            pl.BlockSpec((1, cout_p), lambda b, t, lens: (0, 0)),
        ]
        inputs += [res["x"], res["w"], res["shift"]]

    scratch = [pltpu.VMEM((tT + 2 * halo, cin_p), jnp.bfloat16)]

    kernel = functools.partial(_conv_bn_kernel, kernel_size=K, pad=pad,
                               halo=halo, time_tile=tT, apply_relu=apply_relu,
                               fuse_residual=fuse)
    out = pl.pallas_call(
        kernel,
        out_shape=jax.ShapeDtypeStruct((B, T_pad, cout_p), jnp.bfloat16),
        grid_spec=pltpu.PrefetchScalarGridSpec(
            num_scalar_prefetch=1,
            grid=(B, nt),
            in_specs=in_specs,
            out_specs=pl.BlockSpec((1, tT, cout_p), lambda b, t, lens: (b, t, 0)),
            scratch_shapes=scratch,
        ),
        compiler_params=pltpu.CompilerParams(
            dimension_semantics=("parallel", "parallel"),
            # 48 MiB fits under v7x's 64 MiB physical VMEM and leaves headroom;
            # sweep up to ~96 MiB on v5e/v6e (128 MiB) for larger time tiles.
            vmem_limit_bytes=48 * 1024 * 1024),
    )(lengths, *inputs)

    # MaskedConv1d.get_seq_len (stride=1, dilation=1)
    new_lengths = (lengths + 2 * pad - (kernel_size - 1) - 1) // 1 + 1
    return out, new_lengths


# --------------------------------------------------------------------------- #
# Parameter construction + packing (fold BN scale into bf16 weights, pad chans)
# --------------------------------------------------------------------------- #
def _pack_conv_bn(w, gamma, beta, mean, var):
    k, cin, cout = w.shape
    cin_p, cout_p = _round_up(cin, LANE), _round_up(cout, LANE)
    scale, shift = _fold_bn(gamma, beta, mean, var)
    w_sc = w * scale[None, None, :]                         # fold BN scale
    w_p = jnp.pad(w_sc, ((0, 0), (0, cin_p - cin), (0, cout_p - cout)))
    return {
        "w": w_p.astype(jnp.bfloat16),                      # (K, Cin_p, Cout_p)
        "shift": jnp.pad(shift, (0, cout_p - cout))[None, :].astype(jnp.float32),
    }


def init_quartznet_block(key, in_channels, out_channels, repeat, kernel_size,
                         residual=True):
    """Random parameters: conv w (K, Cin, Cout) + BN stats (PyTorch-equivalent)."""
    def conv_bn(k_, ksz, cin, cout):
        kw, kg, kb, km, kv = jax.random.split(k_, 5)
        return {
            "w": jax.random.normal(kw, (ksz, cin, cout), jnp.float32)
                 * (1.0 / np.sqrt(cin * ksz)),
            "gamma": jax.random.uniform(kg, (cout,), jnp.float32, 0.5, 1.5),
            "beta": jax.random.normal(kb, (cout,), jnp.float32) * 0.1,
            "mean": jax.random.normal(km, (cout,), jnp.float32) * 0.1,
            "var": jax.random.uniform(kv, (cout,), jnp.float32, 0.5, 1.5),
        }

    raw = {"conv": [], "res": None}
    cin = in_channels
    for _ in range(repeat):
        key, sub = jax.random.split(key)
        raw["conv"].append(conv_bn(sub, kernel_size, cin, out_channels))
        cin = out_channels
    if residual:
        key, sub = jax.random.split(key)
        raw["res"] = conv_bn(sub, 1, in_channels, out_channels)
    return raw


def pack_quartznet_block(raw):
    packed = {
        "conv": [_pack_conv_bn(**l) for l in raw["conv"]],
        "res": None,
        "out_channels": raw["conv"][-1]["w"].shape[2],
    }
    if raw["res"] is not None:
        r = _pack_conv_bn(**raw["res"])
        packed["res"] = {"w": r["w"][0], "shift": r["shift"]}   # (Cin_p, Cout_p)
    return packed


# --------------------------------------------------------------------------- #
# Block forward
# --------------------------------------------------------------------------- #
def _choose_time_tile(T, halo, target):
    unit = max(halo, 8)
    tT = (min(target, max(T, unit)) // unit) * unit
    return max(tT, unit)


def quartznet_block_forward(x_nct, lengths, packed, *, kernel_size=11,
                            time_tile=256):
    """x_nct: (B, C_in, T) f32 (PyTorch layout), lengths: (B,) int32."""
    pad = (kernel_size - 1) // 2          # get_same_padding (stride=1, dil=1)
    halo = _round_up(pad, 8) if pad > 0 else 0
    B, cin, T = x_nct.shape
    cin_p = _round_up(cin, LANE)
    cout = packed["out_channels"]

    tT = _choose_time_tile(T, halo, time_tile)
    T_pad = _round_up(T, tT)              # pad T once; masking keeps pad inert

    # NCT -> NTC bf16 (channels on lanes / MXU contraction); pad channels + time.
    x = jnp.transpose(x_nct, (0, 2, 1)).astype(jnp.bfloat16)
    x = jnp.pad(x, ((0, 0), (0, T_pad - T), (0, cin_p - cin)))

    out, lens = x, lengths.astype(jnp.int32)
    n = len(packed["conv"])
    for i, layer in enumerate(packed["conv"]):
        last = i == n - 1
        res = None
        if last and packed["res"] is not None:
            res = dict(packed["res"], x=x)   # fuse residual into the last kernel
        # ReLU placement: intermediate layers ReLU their conv+BN output; the
        # last layer ReLUs after the (fused) residual add (the block's `mout`).
        out, lens = masked_conv_bn(out, lens, layer,
                                   kernel_size=kernel_size, pad=pad, halo=halo,
                                   time_tile=tT, apply_relu=True, res=res)
    # drop channel/time padding, back to f32 PyTorch NCT layout
    out = out[:, :T, :cout].astype(jnp.float32)
    return jnp.transpose(out, (0, 2, 1)), lens


# --------------------------------------------------------------------------- #
# Pure-JAX reference (same math; bf16 weights/activations mirroring the kernel)
# --------------------------------------------------------------------------- #
def _ref_masked_conv_bn(x_bf16, lengths, w, gamma, beta, mean, var, *, pad):
    B, T, _ = x_bf16.shape
    K, _, cout = w.shape
    scale, shift = _fold_bn(gamma, beta, mean, var)
    wb = (w * scale[None, None, :]).astype(jnp.bfloat16)
    mask = (jnp.arange(T)[None, :] < lengths[:, None])[:, :, None]
    xm = jnp.where(mask, x_bf16, jnp.zeros_like(x_bf16))
    xp = jnp.pad(xm, ((0, 0), (pad, pad), (0, 0)))
    t_out = T + 2 * pad - (K - 1)
    y = jnp.zeros((B, t_out, cout), jnp.float32)
    for k in range(K):
        y = y + jnp.einsum("btc,cd->btd", xp[:, k:k + t_out, :], wb[k],
                           preferred_element_type=jnp.float32)
    y = y + shift
    new_len = (lengths + 2 * pad - (K - 1) - 1) // 1 + 1
    return y, new_len


def ref_forward(x_nct, lengths, raw, *, kernel_size):
    pad = (kernel_size - 1) // 2
    x = jnp.transpose(x_nct, (0, 2, 1)).astype(jnp.bfloat16)
    out, lens = x, lengths
    n = len(raw["conv"])
    y = None
    for i, l in enumerate(raw["conv"]):
        y, lens = _ref_masked_conv_bn(out, lens, pad=pad, **l)
        if i != n - 1:
            out = jnp.maximum(y, 0.0).astype(jnp.bfloat16)   # bf16 intermediate
    out = y                                                  # last layer, f32
    if raw["res"] is not None:
        r, _ = _ref_masked_conv_bn(x, lengths, pad=0, **raw["res"])
        out = out + r
    out = jnp.maximum(out, 0.0).astype(jnp.bfloat16)         # mout ReLU + store
    return jnp.transpose(out.astype(jnp.float32), (0, 2, 1)), lens


# --------------------------------------------------------------------------- #
if __name__ == "__main__":
    B, C_IN, C_OUT, T = 2, 16, 32, 60          # T=60: exercises time padding
    REPEAT, KSIZE = 3, 11

    key = jax.random.PRNGKey(0)
    key, kx = jax.random.split(key)
    x = jax.random.normal(kx, (B, C_IN, T), jnp.float32)   # PyTorch NCT layout
    lengths = jnp.array([T, 40], dtype=jnp.int32)

    raw = init_quartznet_block(key, C_IN, C_OUT, REPEAT, KSIZE, residual=True)
    packed = pack_quartznet_block(raw)

    # time_tile=32 -> 2 time tiles per batch: exercises the halo-block fetches,
    # the sequence-edge zeroing and the T -> T_pad padding path.
    out, lens_out = quartznet_block_forward(x, lengths, packed,
                                            kernel_size=KSIZE, time_tile=32)
    out = jax.block_until_ready(out)
    lens_out = jax.block_until_ready(lens_out)

    ref_out, ref_lens = ref_forward(x, lengths, raw, kernel_size=KSIZE)
    np.testing.assert_allclose(np.asarray(out), np.asarray(ref_out),
                               rtol=1e-2, atol=1e-2)
    np.testing.assert_array_equal(np.asarray(lens_out), np.asarray(ref_lens))
    assert out.shape == (B, C_OUT, T)

    print("KERNEL_OK")
</pallas_src>

<mosaic_0001>
module attributes {stable_mosaic.version = 11 : i64} {
  func.func @_conv_bn_kernel(%arg0: i32, %arg1: i32, %arg2: memref<2xi32, #tpu.memory_space<smem>>, %arg3: memref<1x32x128xbf16, #tpu.memory_space<vmem>>, %arg4: memref<1x8x128xbf16, #tpu.memory_space<vmem>>, %arg5: memref<1x8x128xbf16, #tpu.memory_space<vmem>>, %arg6: memref<11x128x128xbf16, #tpu.memory_space<vmem>>, %arg7: memref<1x128xf32, #tpu.memory_space<vmem>>, %arg8: memref<1x32x128xbf16, #tpu.memory_space<vmem>>, %arg9: memref<48x128xbf16, #tpu.memory_space<vmem>>) attributes {dimension_semantics = [#tpu.dimension_semantics<parallel>, #tpu.dimension_semantics<parallel>], iteration_bounds = array<i64: 2, 2>, scalar_prefetch = 1 : i64, scratch_operands = 1 : i64, tpu.core_type = #tpu.core_type<tc>, window_params = [{transform_indices = @transform_0, window_bounds = array<i64: 1, 32, 128>}, {transform_indices = @transform_1, window_bounds = array<i64: 1, 8, 128>}, {transform_indices = @transform_2, window_bounds = array<i64: 1, 8, 128>}, {pipeline_mode = #tpu.pipeline_mode<synchronous>, transform_indices = @transform_3, window_bounds = array<i64: 11, 128, 128>}, {pipeline_mode = #tpu.pipeline_mode<synchronous>, transform_indices = @transform_4, window_bounds = array<i64: 1, 128>}, {transform_indices = @transform_5, window_bounds = array<i64: 1, 32, 128>}]} {
    %c32_i32 = arith.constant 32 : i32
    %0 = arith.muli %arg1, %c32_i32 : i32
    %1 = arith.index_cast %arg0 : i32 to index
    %2 = memref.load %arg2[%1] : memref<2xi32, #tpu.memory_space<smem>>
    %3 = tpu.iota {dimensions = array<i32: 0>} : vector<32x1xi32>
    %4 = vector.broadcast %0 : i32 to vector<32x1xi32>
    %5 = arith.addi %3, %4 : vector<32x1xi32>
    %6 = vector.broadcast %2 : i32 to vector<32x1xi32>
    %7 = arith.cmpi slt, %5, %6 : vector<32x1xi32>
    %c0 = arith.constant 0 : index
    %c0_0 = arith.constant 0 : index
    %c0_1 = arith.constant 0 : index
    %8 = vector.load %arg3[%c0, %c0_0, %c0_1] : memref<1x32x128xbf16, #tpu.memory_space<vmem>>, vector<1x32x128xbf16>
    %9 = vector.shape_cast %8 : vector<1x32x128xbf16> to vector<32x128xbf16>
    %cst = arith.constant 0.000000e+00 : f32
    %10 = arith.truncf %cst : f32 to bf16
    %11 = vector.shape_cast %7 : vector<32x1xi1> to vector<32x1xi1>
    %12 = vector.broadcast %11 : vector<32x1xi1> to vector<32x128xi1>
    %13 = vector.broadcast %10 : bf16 to vector<32x128xbf16>
    %14 = arith.select %12, %9, %13 : vector<32x128xi1>, vector<32x128xbf16>
    %c8 = arith.constant 8 : index
    %c0_2 = arith.constant 0 : index
    %15 = vector.load %arg9[%c8, %c0_2] : memref<48x128xbf16, #tpu.memory_space<vmem>>, vector<32x128xbf16>
    tpu.vector_store %arg9[%c8, %c0_2], %14 {strides = array<i32>} : memref<48x128xbf16, #tpu.memory_space<vmem>>, vector<32x128xbf16>,
    %16 = tpu.iota {dimensions = array<i32: 0>} : vector<8x1xi32>
    %c8_i32 = arith.constant 8 : i32
    %17 = arith.subi %0, %c8_i32 : i32
    %18 = vector.broadcast %17 : i32 to vector<8x1xi32>
    %19 = arith.addi %16, %18 : vector<8x1xi32>
    %c0_i32 = arith.constant 0 : i32
    %20 = vector.broadcast %c0_i32 : i32 to vector<8x1xi32>
    %21 = arith.cmpi sge, %19, %20 : vector<8x1xi32>
    %22 = vector.broadcast %2 : i32 to vector<8x1xi32>
    %23 = arith.cmpi slt, %19, %22 : vector<8x1xi32>
    %24 = arith.andi %21, %23 : vector<8x1xi1>
    %c0_3 = arith.constant 0 : index
    %c0_4 = arith.constant 0 : index
    %c0_5 = arith.constant 0 : index
    %25 = vector.load %arg4[%c0_3, %c0_4, %c0_5] : memref<1x8x128xbf16, #tpu.memory_space<vmem>>, vector<1x8x128xbf16>
    %26 = vector.shape_cast %25 : vector<1x8x128xbf16> to vector<8x128xbf16>
    %cst_6 = arith.constant 0.000000e+00 : f32
    %27 = arith.truncf %cst_6 : f32 to bf16
    %28 = vector.shape_cast %24 : vector<8x1xi1> to vector<8x1xi1>
    %29 = vector.broadcast %28 : vector<8x1xi1> to vector<8x128xi1>
    %30 = vector.broadcast %27 : bf16 to vector<8x128xbf16>
    %31 = arith.select %29, %26, %30 : vector<8x128xi1>, vector<8x128xbf16>
    %c0_7 = arith.constant 0 : index
    %c0_8 = arith.constant 0 : index
    %32 = vector.load %arg9[%c0_7, %c0_8] : memref<48x128xbf16, #tpu.memory_space<vmem>>, vector<8x128xbf16>
    tpu.vector_store %arg9[%c0_7, %c0_8], %31 {strides = array<i32>} : memref<48x128xbf16, #tpu.memory_space<vmem>>, vector<8x128xbf16>,
    %33 = tpu.iota {dimensions = array<i32: 0>} : vector<8x1xi32>
    %c32_i32_9 = arith.constant 32 : i32
    %34 = arith.addi %0, %c32_i32_9 : i32
    %35 = vector.broadcast %34 : i32 to vector<8x1xi32>
    %36 = arith.addi %33, %35 : vector<8x1xi32>
    %37 = vector.broadcast %2 : i32 to vector<8x1xi32>
    %38 = arith.cmpi slt, %36, %37 : vector<8x1xi32>
    %c0_10 = arith.constant 0 : index
    %c0_11 = arith.constant 0 : index
    %c0_12 = arith.constant 0 : index
    %39 = vector.load %arg5[%c0_10, %c0_11, %c0_12] : memref<1x8x128xbf16, #tpu.memory_space<vmem>>, vector<1x8x128xbf16>
    %40 = vector.shape_cast %39 : vector<1x8x128xbf16> to vector<8x128xbf16>
    %cst_13 = arith.constant 0.000000e+00 : f32
    %41 = arith.truncf %cst_13 : f32 to bf16
    %42 = vector.shape_cast %38 : vector<8x1xi1> to vector<8x1xi1>
    %43 = vector.broadcast %42 : vector<8x1xi1> to vector<8x128xi1>
    %44 = vector.broadcast %41 : bf16 to vector<8x128xbf16>
    %45 = arith.select %43, %40, %44 : vector<8x128xi1>, vector<8x128xbf16>
    %c40 = arith.constant 40 : index
    %c0_14 = arith.constant 0 : index
    %46 = vector.load %arg9[%c40, %c0_14] : memref<48x128xbf16, #tpu.memory_space<vmem>>, vector<8x128xbf16>
    tpu.vector_store %arg9[%c40, %c0_14], %45 {strides = array<i32>} : memref<48x128xbf16, #tpu.memory_space<vmem>>, vector<8x128xbf16>,
    %cst_15 = arith.constant 0.000000e+00 : f32
    %47 = vector.broadcast %cst_15 : f32 to vector<32x128xf32>
    %c3 = arith.constant 3 : index
    %c0_16 = arith.constant 0 : index
    %48 = vector.load %arg9[%c3, %c0_16] : memref<48x128xbf16, #tpu.memory_space<vmem>>, vector<32x128xbf16>
    %c0_17 = arith.constant 0 : index
    %c0_18 = arith.constant 0 : index
    %c0_19 = arith.constant 0 : index
    %49 = vector.load %arg6[%c0_17, %c0_18, %c0_19] : memref<11x128x128xbf16, #tpu.memory_space<vmem>>, vector<1x128x128xbf16>
    %50 = vector.shape_cast %49 : vector<1x128x128xbf16> to vector<128x128xbf16>
    %cst_20 = arith.constant dense<0.000000e+00> : vector<32x128xf32>
    %51 = tpu.matmul %48, %50, %cst_20 {dimension_numbers = #tpu.dot_dimension_numbers<[1], [0], [0], [1], [0, 0, 1, 1], [], []>} : vector<32x128xbf16>, vector<128x128xbf16>, vector<32x128xf32> -> vector<32x128xf32>
    %52 = arith.addf %47, %51 : vector<32x128xf32>
    %c4 = arith.constant 4 : index
    %c0_21 = arith.constant 0 : index
    %53 = vector.load %arg9[%c4, %c0_21] : memref<48x128xbf16, #tpu.memory_space<vmem>>, vector<32x128xbf16>
    %c1 = arith.constant 1 : index
    %c0_22 = arith.constant 0 : index
    %c0_23 = arith.constant 0 : index
    %54 = vector.load %arg6[%c1, %c0_22, %c0_23] : memref<11x128x128xbf16, #tpu.memory_space<vmem>>, vector<1x128x128xbf16>
    %55 = vector.shape_cast %54 : vector<1x128x128xbf16> to vector<128x128xbf16>
    %cst_24 = arith.constant dense<0.000000e+00> : vector<32x128xf32>
    %56 = tpu.matmul %53, %55, %cst_24 {dimension_numbers = #tpu.dot_dimension_numbers<[1], [0], [0], [1], [0, 0, 1, 1], [], []>} : vector<32x128xbf16>, vector<128x128xbf16>, vector<32x128xf32> -> vector<32x128xf32>
    %57 = arith.addf %52, %56 : vector<32x128xf32>
    %c5 = arith.constant 5 : index
    %c0_25 = arith.constant 0 : index
    %58 = vector.load %arg9[%c5, %c0_25] : memref<48x128xbf16, #tpu.memory_space<vmem>>, vector<32x128xbf16>
    %c2 = arith.constant 2 : index
    %c0_26 = arith.constant 0 : index
    %c0_27 = arith.constant 0 : index
    %59 = vector.load %arg6[%c2, %c0_26, %c0_27] : memref<11x128x128xbf16, #tpu.memory_space<vmem>>, vector<1x128x128xbf16>
    %60 = vector.shape_cast %59 : vector<1x128x128xbf16> to vector<128x128xbf16>
    %cst_28 = arith.constant dense<0.000000e+00> : vector<32x128xf32>
    %61 = tpu.matmul %58, %60, %cst_28 {dimension_numbers = #tpu.dot_dimension_numbers<[1], [0], [0], [1], [0, 0, 1, 1], [], []>} : vector<32x128xbf16>, vector<128x128xbf16>, vector<32x128xf32> -> vector<32x128xf32>
    %62 = arith.addf %57, %61 : vector<32x128xf32>
    %c6 = arith.constant 6 : index
    %c0_29 = arith.constant 0 : index
    %63 = vector.load %arg9[%c6, %c0_29] : memref<48x128xbf16, #tpu.memory_space<vmem>>, vector<32x128xbf16>
    %c3_30 = arith.constant 3 : index
    %c0_31 = arith.constant 0 : index
    %c0_32 = arith.constant 0 : index
    %64 = vector.load %arg6[%c3_30, %c0_31, %c0_32] : memref<11x128x128xbf16, #tpu.memory_space<vmem>>, vector<1x128x128xbf16>
    %65 = vector.shape_cast %64 : vector<1x128x128xbf16> to vector<128x128xbf16>
    %cst_33 = arith.constant dense<0.000000e+00> : vector<32x128xf32>
    %66 = tpu.matmul %63, %65, %cst_33 {dimension_numbers = #tpu.dot_dimension_numbers<[1], [0], [0], [1], [0, 0, 1, 1], [], []>} : vector<32x128xbf16>, vector<128x128xbf16>, vector<32x128xf32> -> vector<32x128xf32>
    %67 = arith.addf %62, %66 : vector<32x128xf32>
    %c7 = arith.constant 7 : index
    %c0_34 = arith.constant 0 : index
    %68 = vector.load %arg9[%c7, %c0_34] : memref<48x128xbf16, #tpu.memory_space<vmem>>, vector<32x128xbf16>
    %c4_35 = arith.constant 4 : index
    %c0_36 = arith.constant 0 : index
    %c0_37 = arith.constant 0 : index
    %69 = vector.load %arg6[%c4_35, %c0_36, %c0_37] : memref<11x128x128xbf16, #tpu.memory_space<vmem>>, vector<1x128x128xbf16>
    %70 = vector.shape_cast %69 : vector<1x128x128xbf16> to vector<128x128xbf16>
    %cst_38 = arith.constant dense<0.000000e+00> : vector<32x128xf32>
    %71 = tpu.matmul %68, %70, %cst_38 {dimension_numbers = #tpu.dot_dimension_numbers<[1], [0], [0], [1], [0, 0, 1, 1], [], []>} : vector<32x128xbf16>, vector<128x128xbf16>, vector<32x128xf32> -> vector<32x128xf32>
    %72 = arith.addf %67, %71 : vector<32x128xf32>
    %c8_39 = arith.constant 8 : index
    %c0_40 = arith.constant 0 : index
    %73 = vector.load %arg9[%c8_39, %c0_40] : memref<48x128xbf16, #tpu.memory_space<vmem>>, vector<32x128xbf16>
    %c5_41 = arith.constant 5 : index
    %c0_42 = arith.constant 0 : index
    %c0_43 = arith.constant 0 : index
    %74 = vector.load %arg6[%c5_41, %c0_42, %c0_43] : memref<11x128x128xbf16, #tpu.memory_space<vmem>>, vector<1x128x128xbf16>
    %75 = vector.shape_cast %74 : vector<1x128x128xbf16> to vector<128x128xbf16>
    %cst_44 = arith.constant dense<0.000000e+00> : vector<32x128xf32>
    %76 = tpu.matmul %73, %75, %cst_44 {dimension_numbers = #tpu.dot_dimension_numbers<[1], [0], [0], [1], [0, 0, 1, 1], [], []>} : vector<32x128xbf16>, vector<128x128xbf16>, vector<32x128xf32> -> vector<32x128xf32>
    %77 = arith.addf %72, %76 : vector<32x128xf32>
    %c9 = arith.constant 9 : index
    %c0_45 = arith.constant 0 : index
    %78 = vector.load %arg9[%c9, %c0_45] : memref<48x128xbf16, #tpu.memory_space<vmem>>, vector<32x128xbf16>
    %c6_46 = arith.constant 6 : index
    %c0_47 = arith.constant 0 : index
    %c0_48 = arith.constant 0 : index
    %79 = vector.load %arg6[%c6_46, %c0_47, %c0_48] : memref<11x128x128xbf16, #tpu.memory_space<vmem>>, vector<1x128x128xbf16>
    %80 = vector.shape_cast %79 : vector<1x128x128xbf16> to vector<128x128xbf16>
    %cst_49 = arith.constant dense<0.000000e+00> : vector<32x128xf32>
    %81 = tpu.matmul %78, %80, %cst_49 {dimension_numbers = #tpu.dot_dimension_numbers<[1], [0], [0], [1], [0, 0, 1, 1], [], []>} : vector<32x128xbf16>, vector<128x128xbf16>, vector<32x128xf32> -> vector<32x128xf32>
    %82 = arith.addf %77, %81 : vector<32x128xf32>
    %c10 = arith.constant 10 : index
    %c0_50 = arith.constant 0 : index
    %83 = vector.load %arg9[%c10, %c0_50] : memref<48x128xbf16, #tpu.memory_space<vmem>>, vector<32x128xbf16>
    %c7_51 = arith.constant 7 : index
    %c0_52 = arith.constant 0 : index
    %c0_53 = arith.constant 0 : index
    %84 = vector.load %arg6[%c7_51, %c0_52, %c0_53] : memref<11x128x128xbf16, #tpu.memory_space<vmem>>, vector<1x128x128xbf16>
    %85 = vector.shape_cast %84 : vector<1x128x128xbf16> to vector<128x128xbf16>
    %cst_54 = arith.constant dense<0.000000e+00> : vector<32x128xf32>
    %86 = tpu.matmul %83, %85, %cst_54 {dimension_numbers = #tpu.dot_dimension_numbers<[1], [0], [0], [1], [0, 0, 1, 1], [], []>} : vector<32x128xbf16>, vector<128x128xbf16>, vector<32x128xf32> -> vector<32x128xf32>
    %87 = arith.addf %82, %86 : vector<32x128xf32>
    %c11 = arith.constant 11 : index
    %c0_55 = arith.constant 0 : index
    %88 = vector.load %arg9[%c11, %c0_55] : memref<48x128xbf16, #tpu.memory_space<vmem>>, vector<32x128xbf16>
    %c8_56 = arith.constant 8 : index
    %c0_57 = arith.constant 0 : index
    %c0_58 = arith.constant 0 : index
    %89 = vector.load %arg6[%c8_56, %c0_57, %c0_58] : memref<11x128x128xbf16, #tpu.memory_space<vmem>>, vector<1x128x128xbf16>
    %90 = vector.shape_cast %89 : vector<1x128x128xbf16> to vector<128x128xbf16>
    %cst_59 = arith.constant dense<0.000000e+00> : vector<32x128xf32>
    %91 = tpu.matmul %88, %90, %cst_59 {dimension_numbers = #tpu.dot_dimension_numbers<[1], [0], [0], [1], [0, 0, 1, 1], [], []>} : vector<32x128xbf16>, vector<128x128xbf16>, vector<32x128xf32> -> vector<32x128xf32>
    %92 = arith.addf %87, %91 : vector<32x128xf32>
    %c12 = arith.constant 12 : index
    %c0_60 = arith.constant 0 : index
    %93 = vector.load %arg9[%c12, %c0_60] : memref<48x128xbf16, #tpu.memory_space<vmem>>, vector<32x128xbf16>
    %c9_61 = arith.constant 9 : index
    %c0_62 = arith.constant 0 : index
    %c0_63 = arith.constant 0 : index
    %94 = vector.load %arg6[%c9_61, %c0_62, %c0_63] : memref<11x128x128xbf16, #tpu.memory_space<vmem>>, vector<1x128x128xbf16>
    %95 = vector.shape_cast %94 : vector<1x128x128xbf16> to vector<128x128xbf16>
    %cst_64 = arith.constant dense<0.000000e+00> : vector<32x128xf32>
    %96 = tpu.matmul %93, %95, %cst_64 {dimension_numbers = #tpu.dot_dimension_numbers<[1], [0], [0], [1], [0, 0, 1, 1], [], []>} : vector<32x128xbf16>, vector<128x128xbf16>, vector<32x128xf32> -> vector<32x128xf32>
    %97 = arith.addf %92, %96 : vector<32x128xf32>
    %c13 = arith.constant 13 : index
    %c0_65 = arith.constant 0 : index
    %98 = vector.load %arg9[%c13, %c0_65] : memref<48x128xbf16, #tpu.memory_space<vmem>>, vector<32x128xbf16>
    %c10_66 = arith.constant 10 : index
    %c0_67 = arith.constant 0 : index
    %c0_68 = arith.constant 0 : index
    %99 = vector.load %arg6[%c10_66, %c0_67, %c0_68] : memref<11x128x128xbf16, #tpu.memory_space<vmem>>, vector<1x128x128xbf16>
    %100 = vector.shape_cast %99 : vector<1x128x128xbf16> to vector<128x128xbf16>
    %cst_69 = arith.constant dense<0.000000e+00> : vector<32x128xf32>
    %101 = tpu.matmul %98, %100, %cst_69 {dimension_numbers = #tpu.dot_dimension_numbers<[1], [0], [0], [1], [0, 0, 1, 1], [], []>} : vector<32x128xbf16>, vector<128x128xbf16>, vector<32x128xf32> -> vector<32x128xf32>
    %102 = arith.addf %97, %101 : vector<32x128xf32>
    %c0_70 = arith.constant 0 : index
    %c0_71 = arith.constant 0 : index
    %103 = vector.load %arg7[%c0_70, %c0_71] : memref<1x128xf32, #tpu.memory_space<vmem>>, vector<1x128xf32>
    %104 = vector.shape_cast %103 : vector<1x128xf32> to vector<128xf32>
    %105 = vector.shape_cast %104 : vector<128xf32> to vector<1x128xf32>
    %106 = vector.broadcast %105 : vector<1x128xf32> to vector<32x128xf32>
    %107 = arith.addf %102, %106 : vector<32x128xf32>
    %cst_72 = arith.constant 0.000000e+00 : f32
    %108 = vector.broadcast %cst_72 : f32 to vector<32x128xf32>
    %109 = arith.maximumf %107, %108 : vector<32x128xf32>
    %110 = arith.truncf %109 : vector<32x128xf32> to vector<32x128xbf16>
    %c0_73 = arith.constant 0 : index
    %c0_74 = arith.constant 0 : index
    %c0_75 = arith.constant 0 : index
    %111 = vector.load %arg8[%c0_73, %c0_74, %c0_75] : memref<1x32x128xbf16, #tpu.memory_space<vmem>>, vector<1x32x128xbf16>
    %112 = vector.shape_cast %111 : vector<1x32x128xbf16> to vector<32x128xbf16>
    %113 = vector.shape_cast %110 : vector<32x128xbf16> to vector<1x32x128xbf16>
    tpu.vector_store %arg8[%c0_73, %c0_74, %c0_75], %113 {strides = array<i32>} : memref<1x32x128xbf16, #tpu.memory_space<vmem>>, vector<1x32x128xbf16>,
    return
  }
  func.func @transform_0(%arg0: i32, %arg1: i32, %arg2: memref<2xi32, #tpu.memory_space<smem>>) -> (i32, i32, i32) {
    %c0_i32 = arith.constant 0 : i32
    %c0_i32_0 = arith.constant 0 : i32
    return %arg0, %arg1, %c0_i32 : i32, i32, i32
  }
  func.func @transform_1(%arg0: i32, %arg1: i32, %arg2: memref<2xi32, #tpu.memory_space<smem>>) -> (i32, i32, i32) {
    %c4_i32 = arith.constant 4 : i32
    %0 = arith.muli %arg1, %c4_i32 : i32
    %c1_i32 = arith.constant 1 : i32
    %1 = arith.subi %0, %c1_i32 : i32
    %c0_i32 = arith.constant 0 : i32
    %2 = arith.maxsi %1, %c0_i32 : i32
    %c0_i32_0 = arith.constant 0 : i32
    %c0_i32_1 = arith.constant 0 : i32
    return %arg0, %2, %c0_i32_0 : i32, i32, i32
  }
  func.func @transform_2(%arg0: i32, %arg1: i32, %arg2: memref<2xi32, #tpu.memory_space<smem>>) -> (i32, i32, i32) {
    %c1_i32 = arith.constant 1 : i32
    %0 = arith.addi %arg1, %c1_i32 : i32
    %c4_i32 = arith.constant 4 : i32
    %1 = arith.muli %0, %c4_i32 : i32
    %c7_i32 = arith.constant 7 : i32
    %2 = arith.minsi %1, %c7_i32 : i32
    %c0_i32 = arith.constant 0 : i32
    %c0_i32_0 = arith.constant 0 : i32
    return %arg0, %2, %c0_i32 : i32, i32, i32
  }
  func.func @transform_3(%arg0: i32, %arg1: i32, %arg2: memref<2xi32, #tpu.memory_space<smem>>) -> (i32, i32, i32) {
    %c0_i32 = arith.constant 0 : i32
    %c0_i32_0 = arith.constant 0 : i32
    %c0_i32_1 = arith.constant 0 : i32
    %c0_i32_2 = arith.constant 0 : i32
    return %c0_i32, %c0_i32_0, %c0_i32_1 : i32, i32, i32
  }
  func.func @transform_4(%arg0: i32, %arg1: i32, %arg2: memref<2xi32, #tpu.memory_space<smem>>) -> (i32, i32) {
    %c0_i32 = arith.constant 0 : i32
    %c0_i32_0 = arith.constant 0 : i32
    %c0_i32_1 = arith.constant 0 : i32
    return %c0_i32, %c0_i32_0 : i32, i32
  }
  func.func @transform_5(%arg0: i32, %arg1: i32, %arg2: memref<2xi32, #tpu.memory_space<smem>>) -> (i32, i32, i32) {
    %c0_i32 = arith.constant 0 : i32
    %c0_i32_0 = arith.constant 0 : i32
    return %arg0, %arg1, %c0_i32 : i32, i32, i32
  }
}

</mosaic_0001>

<bundles_post_ra>
// kernel: tpu_custom_call.1
= control target key start
LH: loop header
LB: loop body
LE: loop exit
PB: predicated region body
PF: predicated region fallthrough
CT: control target
= control target key end

     0   :  { %s3922_s0 = inlined_call_operand.hbm [shape: s32[2], index: 0, kind: input, shape index: {}]   ;;  %s3923_s1 = inlined_call_operand.hbm [shape: bf16[2,64,128], index: 1, kind: input, shape index: {}]   ;;  %s3924_s2 = inlined_call_operand.hbm [shape: bf16[2,64,128], index: 2, kind: input, shape index: {}]   ;;  %s3925_s3 = inlined_call_operand.hbm [shape: bf16[2,64,128], index: 3, kind: input, shape index: {}]   ;;  %s3926_s4 = inlined_call_operand.hbm [shape: bf16[11,128,128], index: 4, kind: input, shape index: {}]   ;;  %s3927_s5 = inlined_call_operand.vmem [shape: f32[1,128], index: 5, kind: input, shape index: {}]   ;;  %s3928_s6 = inlined_call_operand.hbm [shape: bf16[2,64,128], index: 6, kind: output, shape index: {}]  }
   0x1   :  { %3948 = sst [smem:[#allocation30_spill]] %s3923_s1  ;;  %s2941_s23 = scalar_lea.hbm %s3922_s0, 16 }
   0x2   :  { %3949 = sst [smem:[#allocation31_spill]] %s3924_s2  ;;  %p2942_p0 = scmp.ne.s32.totalorder %s3922_s0, %s2941_s23 }
   0x3   :  { %3950 = sst [smem:[#allocation32_spill]] %s3925_s3  ;;  %p2945_p1 = scmp.lt.u32.totalorder %s2941_s23, %s3922_s0 }
   0x4   :  { %3951 = sst [smem:[#allocation33_spill]] %s3926_s4 }
   0x5   :  { %3952 = sst [smem:[#allocation34_spill]] %s3927_s5  ;;  %p2947_p2 = pnand %p2945_p1, %p2942_p0 }
   0x6   :  { %3953 = sst [smem:[#allocation35_spill]] %s3928_s6 }
   0x7   :  { %2950 = shalt.err (!%p2947_p2)  }
   0x8   :  { %s3231_s28 = smov [#allocation4]  }
   0x9   :  { %12 = dma.hbm_to_smem %s3922_s0, 16, %s3231_s28, [#allocation3] }
   0xa   :  { %3153 = dma.done.wait [#allocation3], 16 }
   0xb   :  { %3154 = vsyncadd [#allocation3], 4294967280 }
   0xc   :  { %14 = sfence }
   0xd   :  { %15 = vsyncpa [#allocation6], 0 }
   0xe   :  { %17 = vsyncpa [#allocation6 + $0x1], 0 }
   0xf   :  { %18 = vsyncpa [#allocation9], 0 }
  0x10   :  { %20 = vsyncpa [#allocation9 + $0x1], 0 }
  0x11   :  { %21 = vsyncpa [#allocation12], 0 }
  0x12   :  { %22 = vsyncpa [#allocation7], 0 }
  0x13   :  { %24 = vsyncpa [#allocation7 + $0x1], 0  ;;  %s3288_s7 = smov 0   ;;  %s3290_s8 = smov 0  }
  0x14   :  { %s3292_s9 = smov 0   ;;  %s3294_s10 = smov 0  }
  0x15   :  { %s3296_s11 = smov 0   ;;  %s3298_s0 = smov 0  }
  0x16   :  { %s3300_s12 = smov 0   ;;  %s3302_s13 = smov 0  }
  0x17   :  { %s3304_s14 = smov 0   ;;  %s3306_s15 = smov 0  }
  0x18   :  { %s3308_s16 = smov 0   ;;  %s3310_s17 = smov 0  }
  0x19   :  { %s3312_s18 = smov 0   ;;  %s3314_s19 = smov 0  }
  0x1a LB: > { %3954 = sst [smem:[#allocation20_spill]] %s3193_s11  ;;  %s3359_s20 = sadd.s32 4294967295, %s3229_s19   ;;  %s3229_s19 = sphi %s3314_s19, %s30_s19   ;;  %s3225_s18 = sphi %s3312_s18, %s4011_s18   ;;  %s3221_s17 = sphi %s3310_s17, %s4010_s17   ;;  %s3217_s16 = sphi %s3308_s16, %s4009_s16   ;;  %s3213_s15 = sphi %s3306_s15, %s4008_s15   ;;  %s3209_s14 = sphi %s3304_s14, %s4021_s14   ;;  %s3205_s13 = sphi %s3302_s13, %s4020_s13   ;;  %s3201_s12 = sphi %s3300_s12, %s4019_s12   ;;  %s3197_s0 = sphi %s3298_s0, %s4018_s0   ;;  %s3193_s11 = sphi %s3296_s11, %s4017_s11   ;;  %s3189_s10 = sphi %s3294_s10, %s4016_s10   ;;  %s3185_s9 = sphi %s3292_s9, %s4015_s9   ;;  %s3181_s8 = sphi %s3290_s8, %s4014_s8   ;;  %s3177_s7 = sphi %s3288_s7, %s4013_s7  }
  0x1b   : > { %3955 = sst [smem:[#allocation21_spill]] %s3213_s15  ;;  %s39_s21 = sadd.s32 1, %s3221_s17 }
  0x1c   : > { %3956 = sst [smem:[#allocation22_spill]] %s3217_s16  ;;  %p40_p3 = scmp.ge.s32.totalorder %s39_s21, 2 }
  0x1d   : > { %3957 = sst [smem:[#allocation23_spill]] %s3221_s17  ;;  %s42_s22 = sadd.s32 1, %s3225_s18 }
  0x1e   : > { %3958 = sst [smem:[#allocation24_spill]] %s3225_s18  ;;  %p3940_p4 = scmp.eq.s32.totalorder %s3229_s19, 0 }
  0x1f   : > { %p3941_p5 = scmp.eq.s32.totalorder %s3359_s20, 0  ;;  %s4023_s21 = smov (%p40_p3, %s39_s21), 0 }
  0x20   : > { %3959 = sst [smem:[#allocation25_spill]] %s4023_s21  ;;  %s4025_s22 = smov (!%p40_p3, %s42_s22), %s3225_s18 }
  0x21   : > { %s47_s23 = ssub.s32 %s3221_s17, %s4023_s21  ;;  %s3371_s24 = sshll.u32 %s3221_s17, 2 }
  0x22   : > { %p44_p6 = scmp.ge.s32.totalorder %s4025_s22, 2  ;;  %s2178_s25 = sadd.s32 4294967295, %s3371_s24 }
  0x23   : > { %p76_p7 = scmp.gt.s32.totalorder %s2178_s25, 0  ;;  %s2179_s26 = sshll.u32 %s4023_s21, 2 }
  0x24   : > { %s4027_s22 = smov (%p44_p6, %s4025_s22), 0  ;;  %s2180_s28 = sadd.s32 4294967295, %s2179_s26 }
  0x25   : > { %3960 = sst [smem:[#allocation26_spill]] %s4027_s22  ;;  %s4029_s25 = smov (!%p76_p7, %s2178_s25), 0 }
  0x26   : > { %s3379_s27 = ssub.s32 %s3225_s18, %s4027_s22  ;;  %p80_p8 = scmp.gt.s32.totalorder %s2180_s28, 0 }
  0x27   : > { %3961 = sst [smem:[#allocation27_spill]] %s3379_s27  ;;  %s3382_s29 = sor.u32 %s47_s23, %s3379_s27 }
  0x28   : > { %s87_s30 = sadd.s32 1, %s3197_s0  ;;  %s4031_s28 = smov (!%p80_p8, %s2180_s28), 0 }
  0x29   : > { %p94_p10 = scmp.ne.s32.totalorder %s3197_s0, %s3193_s11  ;;  %p100_p11 = scmp.ne.s32.totalorder %s3193_s11, %s3189_s10 }
  0x2a   : > { %s83_s22 = ssub.s32 %s4029_s25, %s4031_s28  ;;  %s3390_s21 = sadd.s32 4, %s2179_s26 }
  0x2b   : > { %s84_s17 = sor.u32 %s83_s22, %s3379_s27  ;;  %p3395_p12 = por %p94_p10, %p3940_p4 }
  0x2c   : > { %p85_p13 = scmp.eq.s32.totalorder %s84_s17, 0  ;;  %p3401_p0 = por %p100_p11, %p3941_p5 }
  0x2d   : > { %p3939_p2 = scmp.lt.s32.totalorder %s3229_s19, 4  ;;  %s3411_s26 = sshll.u32 %s3225_s18, 3 }
  0x2e   : > { %s3963_s6 = scalar_select %p3401_p0, 1, 0 }
  0x2f   : > { %s3407_s10 = scalar_select %p85_p13, %s3197_s0, %s87_s30  }
  0x30   : > { %s269_s22 = sand.u32 1, %s3229_s19   ;;  %s256_s28 = sadd.s32 %s3411_s26, %s3371_s24 }
  0x31   : > { %3964 = sst [smem:[#allocation28_spill]] %s3407_s10  ;;  %s271_s5 = sand.u32 1, %s3197_s0  }
  0x32   : > { %s282_s15 = sadd.s32 %s3411_s26, %s4029_s25  ;;  %s2190_s16 = sshll.u32 %s271_s5, 2 }
  0x33   : > { %s2194_s11 = sshll.u32 %s282_s15, 6  ;;  %s3965_s2 = sld [smem:[#allocation31_spill]] }
  0x34   : > { %s273_s30 = scalar_lea.vmem [#allocation8], %s2190_s16  ;;  %p3427_p3 = pnand %p3939_p2, %p3395_p12 }
  0x35   : > { %s286_s18 = sshll.u32 %s273_s30, 4  ;;  %s3433_s5 = scalar_lea.sflag [#allocation9], %s269_s22  ;;  %s3431_s18 = int_to_ptr.vmem [resolvable:$true] %s286_s18 }
  0x36   : > { %p2953_p7 = pneg %p3427_p3 }
  0x39   : > { %s3421_s27 = scalar_lea.hbm %s3965_s2, %s2194_s11  ;;  %s2956_s16 = scalar_lea.hbm %s3965_s2, 1024 }
  0x3a   : > { %s2951_s3 = scalar_lea.hbm %s3421_s27, 64  ;;  %p2957_p11 = scmp.lt.u32.totalorder %s3421_s27, %s3965_s2 }
  0x3b   : > { %p2952_p6 = scmp.ne.s32.totalorder %s3421_s27, %s2951_s3  ;;  %p2958_p12 = scmp.lt.u32.totalorder %s2956_s16, %s2951_s3 }
  0x3c   : > { %p2960_p1 = scmp.lt.u32.totalorder %s2951_s3, %s3421_s27 }
  0x3d   : > { %p2954_p8 = pnand %p2953_p7, %p2952_p6  ;;  %p2959_p13 = por %p2958_p12, %p2957_p11 }
  0x3f   : > { %p2955_p10 = pneg %p2954_p8  ;;  %p2961_p2 = por %p2960_p1, %p2959_p13 }
  0x41   : > { %p2962_p4 = pnand %p2961_p2, %p2955_p10 }
  0x43   : > { %2965 = shalt.err (!%p2962_p4)
}
  0x44   : > { %s2966_s22 = scalar_lea.vmem %s3431_s18, 64  ;;  %s3232_s17 = smov [#allocation8]  }
  0x45   : > { %p2967_p6 = scmp.ne.s32.totalorder %s3431_s18, %s2966_s22  ;;  %s2971_s30 = sshll.u32 %s3232_s17, 4  ;;  %s2972_s30 = int_to_ptr.vmem [resolvable:$false] %s2971_s30 }
  0x46   : > { %s2973_s11 = scalar_lea.vmem %s2972_s30, 128  ;;  %p2974_p5 = scmp.lt.s32.totalorder %s3431_s18, %s2972_s30 }
  0x47   : > { %p2969_p8 = pnand %p2967_p6, %p2953_p7  ;;  %p2975_p11 = scmp.lt.s32.totalorder %s2973_s11, %s2966_s22 }
  0x49   : > { %p2970_p9 = pneg %p2969_p8  ;;  %p2976_p12 = por %p2975_p11, %p2974_p5 }
  0x4b   : > { %p2977_p1 = pnand %p2976_p12, %p2970_p9 }
  0x4d   : > { %2980 = shalt.err (!%p2977_p1)
}
  0x4e   : > { %2723 = dma.hbm_to_vmem [thread:$0]  (!%p3427_p3), %s3421_s27, 64, %s3431_s18, %s3433_s5  }
  0x4f   : > { %p2183_p4 = scmp.ge.s32.totalorder %s3229_s19, 1  ;;  %p217_p2 = scmp.lt.s32.totalorder %s3229_s19, 5 }
  0x50   : > { %s3233_s15 = smov [#allocation11]   ;;  %p3968_p9 = scmp.eq.s32.totalorder %s3359_s20, 0 }
  0x51   : > { %p3463_p7 = pnand %p2183_p4, %p217_p2  ;;  %s229_s16 = sshll.u32 %s3233_s15, 4  ;;  %s230_s16 = int_to_ptr.vmem [resolvable:$true] %s229_s16 }
  0x52   : > { %s2176_s25 = sadd.s32 4294967294, %s3229_s19   ;;  %s3970_s4 = sld [smem:[#allocation33_spill]] }
  0x53   : > { %s3967_s3 = scalar_select %p3463_p7, 1, 0 }
  0x54   : > { %p2713_p5 = pneg %p3463_p7 }
  0x56   : > { %p3471_p10 = pnand %p2713_p5, %p3968_p9 }
  0x58   : > { %s2981_s23 = scalar_lea.hbm %s3970_s4, 11264  ;;  %p2983_p13 = pneg %p3471_p10 }
  0x59   : > { %p2982_p3 = scmp.ne.s32.totalorder %s3970_s4, %s2981_s23  ;;  %p2988_p11 = scmp.lt.u32.totalorder %s2981_s23, %s3970_s4 }
  0x5b   : > { %p2984_p6 = pnand %p2983_p13, %p2982_p3 }
  0x5d   : > { %p2985_p8 = pneg %p2984_p6 }
  0x5f   : > { %p2990_p12 = pnand %p2988_p11, %p2985_p8 }
  0x61   : > { %2993 = shalt.err (!%p2990_p12)
}
  0x62   : > { %s2994_s15 = scalar_lea.vmem %s230_s16, 11264  ;;  %p3002_p5 = scmp.lt.s32.totalorder %s230_s16, %s230_s16 }
  0x63   : > { %p2995_p1 = scmp.ne.s32.totalorder %s230_s16, %s2994_s15  ;;  %p3003_p9 = scmp.lt.s32.totalorder %s2994_s15, %s2994_s15 }
  0x65   : > { %p2997_p4 = pnand %p2995_p1, %p2983_p13  ;;  %p3004_p0 = por %p3003_p9, %p3002_p5 }
  0x67   : > { %p2998_p2 = pneg %p2997_p4 }
  0x69   : > { %p3005_p7 = pnand %p3004_p0, %p2998_p2 }
  0x6b   : > { %3008 = shalt.err (!%p3005_p7)
}
  0x6c   : > { %s3944_s18 = smov 64   ;;  %s3945_s27 = smov 4  }
  0x6d   : > { %2716 = dma.hbm_to_vmem [thread:$0]  (!%p3471_p10), %s3970_s4, 11264, %s230_s16, [#allocation12], %s3944_s18, %s3944_s18, %s3945_s27  }
  0x6e   : > { %s51_s17 = sadd.s32 1, %s3209_s14  ;;  %p58_p0 = scmp.ne.s32.totalorder %s3209_s14, %s3205_s13 }
  0x6f   : > { %p3971_p7 = scmp.eq.s32.totalorder %s3382_s29, 0  ;;  %p3973_p3 = scmp.eq.s32.totalorder %s3229_s19, 0 }
  0x70   : > { %p64_p6 = scmp.ne.s32.totalorder %s3205_s13, %s3201_s12  ;;  %p204_p8 = scmp.eq.s32.totalorder %s3359_s20, 3 }
  0x71   : > { %s3501_s30 = scalar_select %p3971_p7, %s3209_s14, %s51_s17  }
  0x72   : > { %p3505_p13 = por %p3973_p3, %p58_p0  ;;  %p210_p11 = scmp.eq.s32.totalorder %s2176_s25, 3 }
  0x73   : > { %3972 = sst [smem:[#allocation29_spill]] %s3501_s30  ;;  %p3975_p12 = scmp.eq.s32.totalorder %s3359_s20, 0 }
  0x74   : > { %s246_s16 = sand.u32 1, %s3209_s14   ;;  %p3519_p10 = por %p204_p8, %p58_p0 }
  0x75   : > { %p3514_p1 = por %p3975_p12, %p64_p6  ;;  %p3523_p4 = por %p210_p11, %p64_p6 }
  0x76   : > { %s3977_s29 = scalar_select %p3519_p10, 1, 0 }
  0x77   : > { %s3978_s15 = scalar_select %p3523_p4, 1, 0 }
  0x78   : > { %s2186_s23 = sshll.u32 %s246_s16, 4  ;;  %s2189_s22 = sshll.u32 %s256_s28, 6 }
  0x79   : > { %s3979_s1 = sld [smem:[#allocation30_spill]]  ;;  %s250_s27 = scalar_lea.vmem [#allocation5], %s2186_s23 }
  0x7a   : > { %s259_s2 = sshll.u32 %s250_s27, 4  ;;  %p3980_p2 = scmp.lt.s32.totalorder %s3229_s19, 4  ;;  %s3535_s2 = int_to_ptr.vmem [resolvable:$true] %s259_s2 }
  0x7b   : > { %s3545_s28 = scalar_lea.sflag [#allocation6], %s246_s16 }
  0x7c   : > { %p3541_p5 = pnand %p3980_p2, %p3505_p13 }
  0x7e   : > { %p3011_p0 = pneg %p3541_p5 }
  0x7f   : > { %s3533_s25 = scalar_lea.hbm %s3979_s1, %s2189_s22  ;;  %s3014_s11 = scalar_lea.hbm %s3979_s1, 1024 }
  0x80   : > { %s3009_s18 = scalar_lea.hbm %s3533_s25, 256  ;;  %p3015_p13 = scmp.lt.u32.totalorder %s3533_s25, %s3979_s1 }
  0x81   : > { %p3010_p9 = scmp.ne.s32.totalorder %s3533_s25, %s3009_s18  ;;  %p3016_p6 = scmp.lt.u32.totalorder %s3014_s11, %s3009_s18 }
  0x82   : > { %p3018_p11 = scmp.lt.u32.totalorder %s3009_s18, %s3533_s25 }
  0x83   : > { %p3012_p7 = pnand %p3011_p0, %p3010_p9  ;;  %p3017_p8 = por %p3016_p6, %p3015_p13 }
  0x85   : > { %p3013_p3 = pneg %p3012_p7  ;;  %p3019_p12 = por %p3018_p11, %p3017_p8 }
  0x87   : > { %p3020_p2 = pnand %p3019_p12, %p3013_p3 }
  0x89   : > { %3023 = shalt.err (!%p3020_p2)
}
  0x8a   : > { %s3024_s16 = scalar_lea.vmem %s3535_s2, 256  ;;  %s3236_s27 = smov [#allocation5]  }
  0x8b   : > { %p3025_p9 = scmp.ne.s32.totalorder %s3535_s2, %s3024_s16  ;;  %s3029_s23 = sshll.u32 %s3236_s27, 4  ;;  %s3030_s23 = int_to_ptr.vmem [resolvable:$false] %s3029_s23 }
  0x8c   : > { %s3031_s22 = scalar_lea.vmem %s3030_s23, 512  ;;  %p3032_p10 = scmp.lt.s32.totalorder %s3535_s2, %s3030_s23 }
  0x8d   : > { %p3027_p7 = pnand %p3025_p9, %p3011_p0  ;;  %p3033_p13 = scmp.lt.s32.totalorder %s3031_s22, %s3024_s16 }
  0x8f   : > { %p3028_p4 = pneg %p3027_p7  ;;  %p3034_p6 = por %p3033_p13, %p3032_p10 }
  0x91   : > { %p3035_p8 = pnand %p3034_p6, %p3028_p4 }
  0x93   : > { %3038 = shalt.err (!%p3035_p8)
}
  0x94   : > { %s3982_s18 = smov 4   ;;  %s3983_s11 = smov 64  }
  0x95   : > { %s3984_s17 = sld [smem:[#allocation27_spill]]  ;;  %s2311_s4 = sadd.s32 4, %s3371_s24 }
  0x96   : > { %2720 = dma.hbm_to_vmem [thread:$0]  (!%p3541_p5), %s3533_s25, 256, %s3535_s2, %s3545_s28, %s3983_s11, %s3983_s11, %s3982_s18  }
  0x97   : > { %p112_p10 = scmp.lt.s32.totalorder %s2311_s4, 7  ;;  %s123_s16 = sadd.s32 1, %s3185_s9 }
  0x98   : > { %p3985_p4 = scmp.lt.s32.totalorder %s3390_s21, 7  ;;  %p130_p0 = scmp.ne.s32.totalorder %s3185_s9, %s3181_s8 }
  0x99   : > { %s4035_s4 = smov (!%p112_p10, %s2311_s4), 7  ;;  %p136_p3 = scmp.ne.s32.totalorder %s3181_s8, %s3177_s7 }
  0x9a   : > { %s4033_s21 = smov (!%p3985_p4, %s3390_s21), 7  ;;  %s295_s23 = sand.u32 1, %s3185_s9  }
  0x9b   : > { %s119_s27 = ssub.s32 %s4035_s4, %s4033_s21  ;;  %p3986_p11 = scmp.eq.s32.totalorder %s3229_s19, 0 }
  0x9c   : > { %s120_s22 = sor.u32 %s119_s27, %s3984_s17  ;;  %p3987_p9 = scmp.eq.s32.totalorder %s3359_s20, 0 }
  0x9d   : > { %p132_p12 = por %p130_p0, %p3986_p11  ;;  %p121_p2 = scmp.eq.s32.totalorder %s120_s22, 0 }
  0x9e   : > { %p3591_p7 = por %p136_p3, %p3987_p9  ;;  %s2195_s2 = sshll.u32 %s295_s23, 2 }
  0x9f   : > { %s306_s24 = sadd.s32 %s3411_s26, %s4035_s4  ;;  %s3989_s30 = sld [smem:[#allocation32_spill]] }
  0xa0   : > { %s3988_s1 = scalar_select %p3591_p7, 1, 0 }
  0xa1   : > { %s3597_s25 = scalar_select %p121_p2, %s3185_s9, %s123_s16  }
  0xa2   : > { %s2198_s28 = sshll.u32 %s306_s24, 6  ;;  %s297_s21 = scalar_lea.vmem [#allocation10], %s2195_s2 }
  0xa3   : > { %s310_s17 = sshll.u32 %s297_s21, 4  ;;  %p3990_p5 = scmp.lt.s32.totalorder %s3229_s19, 4  ;;  %s3604_s17 = int_to_ptr.vmem [resolvable:$true] %s310_s17 }
  0xa5   : > { %s3602_s7 = scalar_lea.hbm %s3989_s30, %s2198_s28  ;;  %p3608_p13 = pnand %p3990_p5, %p132_p12 }
  0xa6   : > { %s3039_s26 = scalar_lea.hbm %s3602_s7, 64  ;;  %s3044_s23 = scalar_lea.hbm %s3989_s30, 1024 }
  0xa7   : > { %p3040_p6 = scmp.ne.s32.totalorder %s3602_s7, %s3039_s26  ;;  %p3041_p8 = pneg %p3608_p13 }
  0xa8   : > { %p3045_p0 = scmp.lt.u32.totalorder %s3602_s7, %s3989_s30  ;;  %p3046_p3 = scmp.lt.u32.totalorder %s3044_s23, %s3039_s26 }
  0xa9   : > { %p3042_p10 = pnand %p3041_p8, %p3040_p6  ;;  %p3048_p12 = scmp.lt.u32.totalorder %s3039_s26, %s3602_s7 }
  0xaa   : > { %p3047_p11 = por %p3046_p3, %p3045_p0 }
  0xab   : > { %p3043_p4 = pneg %p3042_p10 }
  0xac   : > { %p3049_p2 = por %p3048_p12, %p3047_p11 }
  0xae   : > { %p3050_p9 = pnand %p3049_p2, %p3043_p4 }
  0xb0   : > { %3053 = shalt.err (!%p3050_p9)
}
  0xb1   : > { %s3054_s24 = scalar_lea.vmem %s3604_s17, 64  ;;  %s3237_s28 = smov [#allocation10]  }
  0xb2   : > { %p3055_p5 = scmp.ne.s32.totalorder %s3604_s17, %s3054_s24  ;;  %s3059_s18 = sshll.u32 %s3237_s28, 4  ;;  %s3060_s18 = int_to_ptr.vmem [resolvable:$false] %s3059_s18 }
  0xb3   : > { %s3061_s11 = scalar_lea.vmem %s3060_s18, 128  ;;  %p3062_p7 = scmp.lt.s32.totalorder %s3604_s17, %s3060_s18 }
  0xb4   : > { %p3057_p6 = pnand %p3055_p5, %p3041_p8  ;;  %p3063_p0 = scmp.lt.s32.totalorder %s3061_s11, %s3054_s24 }
  0xb6   : > { %p3058_p10 = pneg %p3057_p6  ;;  %p3064_p3 = por %p3063_p0, %p3062_p7 }
  0xb8   : > { %p3065_p11 = pnand %p3064_p3, %p3058_p10 }
  0xba   : > { %3068 = shalt.err (!%p3065_p11)
}
  0xbb   : > { %2726 = dma.hbm_to_vmem [thread:$0]  (!%p3608_p13), %s3602_s7, 64, %s3604_s17, %s3433_s5  }
  0xbc   : > { %p3992_p4 = scmp.ne.s32.totalorder %s3967_s3, 0 }
  0xbd   : > { %s3641_s21 = sand.u32 (!%p3992_p4), 1, %s3205_s13  }
  0xbe   : > { %319 = sbr.rel (%p3992_p4) target bundleno = 648 (0x288), region = 40  ;;  %s2200_s26 = sshll.u32 (!%p3992_p4), %s3641_s21, 4 }
  0xbf   : > { %s322_s4 = scalar_lea.sflag (!%p3992_p4), [#allocation6], %s3641_s21  ;;  %s3647_s16 = scalar_lea.vmem (!%p3992_p4), [#allocation5], %s2200_s26 }
  0xc5   : > { %3156 = dma.done.wait (%p3514_p1), %s322_s4, 256  }
  0xc6   : > { %3158 = vsyncadd (%p3514_p1), %s322_s4, 4294967040  ;;  %s3993_s5 = sld [smem:[#allocation20_spill]]  ;;  %s330_s3 = sand.u32 1, %s3359_s20  }
  0xc7   : > { %s331_s27 = scalar_lea.sflag [#allocation9], %s330_s3  ;;  %p3994_p7 = scmp.ne.s32.totalorder %s3963_s6, 0 }
  0xcc   : > { %s332_s7 = sand.u32 1, %s3993_s5  }
  0xcd   : > { %s3655_s17 = sshll.u32 %s332_s7, 2 }
  0xce   : > { %s334_s23 = scalar_lea.vmem [#allocation8], %s3655_s17 }
  0xcf   : > { %3160 = dma.done.wait (%p3994_p7), %s331_s27, 64  }
  0xd0   : > { %3162 = vsyncadd (%p3994_p7), %s331_s27, 4294967232  ;;  %s341_s22 = sand.u32 1, %s3181_s8   ;;  %p3995_p1 = scmp.ne.s32.totalorder %s3988_s1, 0 }
  0xd1   : > { %s3663_s10 = sshll.u32 %s341_s22, 2 }
  0xd2   : > { %s343_s2 = scalar_lea.vmem [#allocation10], %s3663_s10 }
  0xd3   : > { %3164 = dma.done.wait (%p3995_p1), %s331_s27, 64  }
  0xd4   : > { %3166 = vsyncadd (%p3995_p1), %s331_s27, 4294967232  ;;  %p3996_p13 = scmp.eq.s32.totalorder %s3359_s20, 0 }
  0xd6   : > { %3168 = dma.done.wait (%p3996_p13), [#allocation12], 11264   ;;  %p3997_p8 = pmov %p3996_p13 }
  0xd7   : > { %s3998_s6 = sld [smem:[#allocation22_spill]]  ;;  %s3999_s24 = sld [smem:[#allocation21_spill]]  ;;  %v2853_v0 = vld [vmem:[#allocation11 + $0x40] sm:$0xff]   ;;  %v397_v2 = vlaneseq  ;;  %v2855_v3 = vld [vmem:[#allocation11 + $0x48] sm:$0xff]   ;;  %v2857_v5 = vld [vmem:[#allocation11 + $0x50] sm:$0xff]   ;;  %vm515_vm12 = vcmask 1045504  }
  0xd8   : > { %3170 = vsyncadd (%p3997_p8), [#allocation12], 4294956032  ;;  %v2854_v1 = vld [vmem:[#allocation11 + $0x140] sm:$0xff]   ;;  %2441 = vmatprep.subr.bf16.mxu1 %v2853_v0  ;;  %v2856_v4 = vld [vmem:[#allocation11 + $0x148] sm:$0xff]   ;;  %vm1181_vm13 = vcmask 1043456   ;;  %s383_s17 = scalar_lea.vmem [#allocation13], %s2200_s26 }
  0xd9   : > { %2541 = vmatprep.subr.bf16.mxu0 %v2854_v1  ;;  %2442 = vmatpush3.bf16.msra.mxu1 %v2853_v0  ;;  %v2858_v6 = vld [vmem:[#allocation11 + $0x150] sm:$0xff]   ;;  %v3678_v7 = vshrl.u32 %v397_v2, 7  ;;  %v2859_v10 = vld [vmem:[#allocation11 + $0x58] sm:$0xff]   ;;  %v2861_v18 = vld [vmem:[#allocation11 + $0x60] sm:$0xff]   ;;  %vm1308_vm14 = vsmask.f32 3328 }
  0xda   : > { %2542 = vmatpush3.bf16.msra.mxu0 %v2854_v1  ;;  %2443 = vmatprep.subr.bf16.mxu1 %v2855_v3  ;;  %v2860_v12 = vld [vmem:[#allocation11 + $0x158] sm:$0xff]   ;;  %v2862_v20 = vld [vmem:[#allocation11 + $0x160] sm:$0xff]   ;;  %v2863_v22 = vld [vmem:[#allocation11 + $0x68] sm:$0xff]   ;;  %vm620_vm15 = vsmask.f32 6400  ;;  %s2028_s27 = sshll.u32 %s383_s17, 4  ;;  %s3839_s27 = int_to_ptr.vmem [resolvable:$true] %s2028_s27 }
  0xdb   : > { %2543 = vmatprep.subr.bf16.mxu0 %v2856_v4  ;;  %v399_v8 = vadd.s32 8, %v3678_v7  ;;  %v400_v11 = vadd.s32 16, %v3678_v7  ;;  %v401_v17 = vadd.s32 24, %v3678_v7  ;;  %v2864_v24 = vld [vmem:[#allocation11 + $0x168] sm:$0xff]   ;;  %v412_v25 = vld [vmem:[%s3647_s16] sm:$0xf] }
  0xdc   : > { %v413_v26 = vld [vmem:[%s3647_s16 + $0x4] sm:$0xf]  ;;  %v414_v27 = vld [vmem:[%s3647_s16 + $0x8] sm:$0xf]  ;;  %v455_v30 = vld [vmem:[%s334_s23] sm:$0xf] }
  0xdd   : > { %s396_s28 = sld [smem:[#allocation4 + %s3998_s6]]  ;;  %s3676_s1 = sshll.u32 %s3999_s24, 5  ;;  %2444 = vmatpush3.bf16.msra.mxu1 %v2855_v3  ;;  %v2865_v28 = vld [vmem:[#allocation11 + $0x70] sm:$0xff]   ;;  %v415_v35 = vld [vmem:[%s3647_s16 + $0xc] sm:$0xf]  ;;  %v2869_v42 = vld [vmem:[#allocation11] sm:$0xff]  }
  0xde   : > { %v402_v9 = vstv %s3676_s1  ;;  %s2209_s20 = sadd.s32 4294967288, %s3676_s1  ;;  %2544 = vmatpush3.bf16.msra.mxu0 %v2856_v4  ;;  %2445 = vmatprep.subr.bf16.mxu1 %v2857_v5  ;;  %v2866_v33 = vld [vmem:[#allocation11 + $0x170] sm:$0xff]   ;;  %v2867_v39 = vld [vmem:[#allocation11 + $0x78] sm:$0xff]   ;;  %s461_s18 = sadd.s32 32, %s3676_s1  ;;  %v2870_v44 = vld [vmem:[#allocation11 + $0x180] sm:$0xff]  }
  0xdf   : > { %2545 = vmatprep.subr.bf16.mxu0 %v2858_v6  ;;  %v403_v13 = vadd.s32 %v402_v9, %v3678_v7  ;;  %v450_v14 = vstv %s2209_s20  ;;  %v404_v15 = vadd.s32 %v402_v9, %v399_v8  ;;  %v405_v19 = vadd.s32 %v402_v9, %v400_v11  ;;  %v2868_v41 = vld [vmem:[#allocation11 + $0x178] sm:$0xff]   ;;  %v2871_v59 = vld [vmem:[#allocation11 + $0x8] sm:$0xff]   ;;  %v2874_v11 = vld [vmem:[#allocation11 + $0x190] sm:$0xff]   ;;  %s4000_s16 = sld [smem:[#allocation34_spill]]  ;;  %s2305_s5 = sshll.u32 %s3999_s24, 2 }
  0xe0   : > { %v451_v21 = vadd.s32 %v450_v14, %v3678_v7  ;;  %v406_v23 = vadd.s32 %v402_v9, %v401_v17  ;;  %v462_v45 = vstv %s461_s18  ;;  %v2872_v60 = vld [vmem:[#allocation11 + $0x188] sm:$0xff]   ;;  %v465_v17 = vld [vmem:[%s343_s2] sm:$0xf]  ;;  %s2306_s3 = sshll.u32 %s3998_s6, 3  ;;  %s4001_s2 = sld [smem:[#allocation35_spill]] }
  0xe1   : > { %2446 = vmatpush3.bf16.msra.mxu1 %v2857_v5  ;;  %v463_v54 = vadd.s32 %v462_v45, %v3678_v7  ;;  %v2873_v7 = vld [vmem:[#allocation11 + $0x10] sm:$0xff]   ;;  %v2884_v45 = vld [vmem:[#allocation11 + $0x1b8] sm:$0xff]   ;;  %s2025_s7 = sadd.s32 %s2306_s3, %s2305_s5  ;;  %s2013_s26 = scalar_lea.sflag [#allocation7], %s3641_s21 }
  0xe2   : > { %2546 = vmatpush3.bf16.msra.mxu0 %v2858_v6  ;;  %2447 = vmatprep.subr.bf16.mxu1 %v2859_v10  ;;  %vm452_vm4 = vcmp.ge.s32.totalorder %v451_v21, 0  ;;  %s2307_s23 = sshll.u32 %s2025_s7, 6  ;;  %s3069_s24 = scalar_lea.vmem %s3839_s27, 256 }
  0xe3   : > { %v3685_v16 = vstv %s396_s28  ;;  %2547 = vmatprep.subr.bf16.mxu0 %v2860_v12  ;;  %p3070_p12 = scmp.ne.s32.totalorder %s3839_s27, %s3069_s24  ;;  %p4002_p2 = scmp.ne.s32.totalorder %s3977_s29, 0 }
  0xe4   : > { %vm408_vm0 = vcmp.lt.s32.totalorder %v403_v13, %v3685_v16  ;;  %vm409_vm1 = vcmp.lt.s32.totalorder %v404_v15, %v3685_v16  ;;  %vm410_vm2 = vcmp.lt.s32.totalorder %v405_v19, %v3685_v16  ;;  %vm453_vm5 = vcmp.lt.s32.totalorder %v451_v21, %v3685_v16  ;;  %s3238_s28 = smov [#allocation13]  }
  0xe5   : > { %2448 = vmatpush3.bf16.msra.mxu1 %v2859_v10  ;;  %vm424_vm3 = vmpackc.low %vm408_vm0, %vm408_vm0  ;;  %vm411_vm8 = vcmp.lt.s32.totalorder %v406_v23, %v3685_v16  ;;  %vm464_vm0 = vcmp.lt.s32.totalorder %v463_v54, %v3685_v16  ;;  %v2876_v23 = vld [vmem:[#allocation11 + $0x198] sm:$0xff]   ;;  %p3071_p9 = pnand %p3070_p12, %p4002_p2  ;;  %s3073_s1 = sshll.u32 %s3238_s28, 4  ;;  %s3074_s1 = int_to_ptr.vmem [resolvable:$false] %s3073_s1 }
  0xe6   : > { %2548 = vmatpush3.bf16.msra.mxu0 %v2860_v12  ;;  %2449 = vmatprep.subr.bf16.mxu1 %v2861_v18  ;;  %vm425_vm6 = vmpackc.low %vm409_vm1, %vm409_vm1  ;;  %v428_v29 = vsel %vm424_vm3, %v412_v25, 0  ;;  %vm1453_vm3 = vcmask 1042432   ;;  %s3844_s6 = scalar_lea.hbm %s4001_s2, %s2307_s23  ;;  %s3075_s20 = scalar_lea.vmem %s3074_s1, 512 }
  0xe7   : > { %2549 = vmatprep.subr.bf16.mxu0 %v2862_v20  ;;  %vm426_vm7 = vmpackc.low %vm410_vm2, %vm410_vm2  ;;  %v429_v31 = vsel %vm425_vm6, %v413_v26, 0  ;;  %v2206_v32 = vcombine.low %v428_v29, %v428_v29  ;;  %v2877_v26 = vld [vmem:[#allocation11 + $0x20] sm:$0xff]   ;;  %v2880_v29 = vld [vmem:[#allocation11 + $0x1a8] sm:$0xff]   ;;  %vm764_vm2 = vsmask.f32 5376  ;;  %p3072_p5 = pneg %p3071_p9  ;;  %p3076_p6 = scmp.lt.s32.totalorder %s3839_s27, %s3074_s1 }
  0xe8   : > { %v430_v34 = vsel %vm426_vm7, %v414_v27, 0  ;;  %vm454_vm9 = vmand %vm452_vm4, %vm453_vm5  ;;  %v2878_v27 = vld [vmem:[#allocation11 + $0x1a0] sm:$0xff]   ;;  %vm1036_vm4 = vsmask.f32 4352  ;;  %vm909_vm5 = vcmask 1044480   ;;  %vm1725_vm7 = vcmask 1041408   ;;  %p3077_p10 = scmp.lt.s32.totalorder %s3075_s20, %s3069_s24 }
  0xe9   : > { %2450 = vmatpush3.bf16.msra.mxu1 %v2861_v18  ;;  %v3701_v36 = vcombine.low %v429_v31, %v430_v34  ;;  %446 = vst [vmem:[#allocation2] sm:$0xf0] %v2206_v32  ;;  %vm458_vm10 = vmpackc.low %vm454_vm9, %vm454_vm9  ;;  %v2882_v34 = vld [vmem:[#allocation11 + $0x1b0] sm:$0xff]   ;;  %vm1580_vm6 = vsmask.f32 2304 }
  0xea   : > { %2550 = vmatpush3.bf16.msra.mxu0 %v2862_v20  ;;  %2451 = vmatprep.subr.bf16.mxu1 %v2863_v22  ;;  %v459_v37 = vsel %vm458_vm10, %v455_v30, 0  ;;  %vm427_vm11 = vmpackc.low %vm411_vm8, %vm411_vm8  ;;  %v2875_v20 = vld [vmem:[#allocation11 + $0x18] sm:$0xff]   ;;  %vm1852_vm8 = vsmask.f32 1280  ;;  %p3078_p0 = por %p3077_p10, %p3076_p6 }
  0xeb   : > { %2551 = vmatprep.subr.bf16.mxu0 %v2864_v24  ;;  %460 = vst [vmem:[#allocation2] sm:$0xf] %v459_v37  ;;  %v431_v38 = vsel %vm427_vm11, %v415_v35, 0  ;;  %v1183_v43 = vrot.slane %v3701_v36, 4  ;;  %v517_v47 = vrot.slane %v3701_v36, 2  ;;  %v3709_v50 = vshrl.u32 %v3701_v36, 16  ;;  %vm468_vm1 = vmpackc.low %vm464_vm0, %vm464_vm0 }
  0xec   : > { %v2208_v40 = vcombine.low %v431_v38, %v431_v38  ;;  %v3712_v51 = vshll.u32 %v3701_v36, 16  ;;  %v469_v19 = vsel %vm468_vm1, %v465_v17, 0  ;;  %p3079_p3 = pnand %p3078_p0, %p3072_p5 }
  0xed   : > { %2452 = vmatpush3.bf16.msra.mxu1 %v2863_v22  ;;  %v632_v63 = vrot.slane %v3709_v50, 1  ;;  %v1317_v6 = vrot.slane %v3709_v50, 4  ;;  %v2210_v22 = vcombine.low %v469_v19, %v469_v19  ;;  %v2896_v19 = vld [vmem:[#allocation11 + $0x1e8] sm:$0xff]  }
  0xee   : > { %2552 = vmatpush3.bf16.msra.mxu0 %v2864_v24  ;;  %2453 = vmatprep.subr.bf16.mxu1 %v2865_v28  ;;  %448 = vst [vmem:[#allocation2 + $0x10] sm:$0xf] %v2208_v40  ;;  %v635_v0 = vrot.slane %v3712_v51, 2  ;;  %v1318_v12 = vrot.slane %v3712_v51, 5  ;;  %v2883_v40 = vld [vmem:[#allocation11 + $0x38] sm:$0xff]  }
  0xef   : > { %2553 = vmatprep.subr.bf16.mxu0 %v2866_v33  ;;  %474 = vst [vmem:[#allocation2 + $0x10] sm:$0xf0] %v2210_v22 }
  0xf0   : > { %v1161_v46 = vld [vmem:[#allocation2] sm:$0xf0]  ;;  %v3731_v15 = vor.u32 %v635_v0, %v632_v63  ;;  %v3735_v18 = vor.u32 %v1318_v12, %v1317_v6  ;;  %v2887_v0 = vld [vmem:[#allocation11 + $0x88] sm:$0xff]   ;;  %v1046_v6 = vrot.slane %v3712_v51, 4 }
  0xf1   : > { %2454 = vmatpush3.bf16.msra.mxu1 %v2865_v28  ;;  %v1182_v48 = vrot.slane %v1161_v46, 4  ;;  %v1310_v55 = vshrl.u32 %v1161_v46, 16  ;;  %v1313_v4 = vshll.u32 %v1161_v46, 16  ;;  %v2879_v28 = vld [vmem:[#allocation11 + $0x28] sm:$0xff]  }
  0xf2   : > { %2554 = vmatpush3.bf16.msra.mxu0 %v2866_v33  ;;  %2455 = vmatprep.subr.bf16.mxu1 %v2867_v39  ;;  %v3706_v49 = vld [vmem:[#allocation2] sm:$0xfc]  ;;  %v2881_v33 = vld [vmem:[#allocation11 + $0x30] sm:$0xff]  }
  0xf3   : > { %2555 = vmatprep.subr.bf16.mxu0 %v2868_v41  ;;  %v516_v52 = vrot.slane %v3706_v49, 2  ;;  %v1184_v53 = vsel %vm1181_vm13, %v1182_v48, %v1183_v43  ;;  %v1312_v3 = vrot.slane %v1310_v55, 4  ;;  %v475_v5 = vld [vmem:[#allocation2] sm:$0xfe]  ;;  %v1315_v10 = vrot.slane %v1313_v4, 5 }
  0xf4   : > { %2557 = vmatprep.mubr.bf16.mxu0 %v1184_v53  ;;  %v622_v8 = vshrl.u32 %v475_v5, 16  ;;  %v625_v9 = vshll.u32 %v475_v5, 16  ;;  %v766_v38 = vshrl.u32 %v3706_v49, 16  ;;  %v773_v48 = vrot.slane %v3709_v50, 2  ;;  %v2885_v53 = vld [vmem:[#allocation11 + $0x80] sm:$0xff]   ;;  %v2889_v5 = vld [vmem:[#allocation11 + $0x90] sm:$0xff]  }
  0xf5   : > { %2456 = vmatpush3.bf16.msra.mxu1 %v2867_v39  ;;  %v518_v56 = vsel %vm515_vm12, %v516_v52, %v517_v47  ;;  %v3718_v57 = vld [vmem:[#allocation2 + $0x10] sm:$0x3]  ;;  %v1316_v16 = vor.u32 %v1315_v10, %v1312_v3  ;;  %v769_v39 = vshll.u32 %v3706_v49, 16  ;;  %v774_v52 = vrot.slane %v3712_v51, 3  ;;  %v3751_v55 = vld [vmem:[#allocation2] sm:$0xe0] }
  0xf6   : > { %2556 = vmatpush3.bf16.msra.mxu0 %v2868_v41  ;;  %2461 = vmatprep.subr.bf16.mxu1 %v2869_v42  ;;  %v3720_v58 = vld [vmem:[#allocation2 + $0x10] sm:$0xf]  ;;  %v519_v61 = vrot.slane %v3718_v57, 2  ;;  %v624_v13 = vrot.slane %v622_v8, 1  ;;  %v627_v14 = vrot.slane %v625_v9, 2  ;;  %v639_v31 = vshrl.u32 %v3718_v57, 16 }
  0xf7   : > { %2561 = vmatprep.subr.bf16.mxu0 %v2870_v44  ;;  %2457 = vmatprep.mubr.bf16.mxu1 %v518_v56  ;;  %v1185_v62 = vrot.slane %v3720_v58, 4  ;;  %v1320_v24 = vsel %vm1308_vm14, %v1316_v16, %v3735_v18  ;;  %v3741_v30 = vld [vmem:[#allocation2 + $0x10] sm:$0x1f]  ;;  %v642_v32 = vshll.u32 %v3718_v57, 16  ;;  %v768_v46 = vrot.slane %v766_v38, 2  ;;  %v2886_v56 = vld [vmem:[#allocation11 + $0x1c0] sm:$0xff]  }
  0xf8   : > { %v520_v1 = vsel %vm515_vm12, %v517_v47, %v519_v61  ;;  %v628_v21 = vor.u32 %v627_v14, %v624_v13  ;;  %v1322_v35 = vshrl.u32 %v3741_v30, 16  ;;  %v1325_v37 = vshll.u32 %v3741_v30, 16  ;;  %v2891_v9 = vld [vmem:[#allocation11 + $0x98] sm:$0xff]   ;;  %v2894_v14 = vld [vmem:[#allocation11 + $0x1e0] sm:$0xff]   ;;  %v3772_v16 = vld [vmem:[#allocation2 + $0x10] sm:$0x7] }
  0xf9   : > { %v1186_v2 = vsel %vm1181_vm13, %v1183_v43, %v1185_v62  ;;  %2458 = vmatmul.mubr.bf16.vlgmr.msra.gmra.mrb[0].mxu1 %v520_v1  ;;  %v641_v41 = vrot.slane %v639_v31, 1  ;;  %v771_v47 = vrot.slane %v769_v39, 3  ;;  %v1455_v61 = vrot.slane %v3701_v36, 5  ;;  %v2888_v1 = vld [vmem:[#allocation11 + $0x1c8] sm:$0xff]   ;;  %v2892_v10 = vld [vmem:[#allocation11 + $0x1d8] sm:$0xff]   ;;  %v2901_v39 = vld [vmem:[#allocation11 + $0xc0] sm:$0xff]  }
  0xfa   : > { %2558 = vmatmul.mubr.bf16.vlgmr.msra.gmra.mrb[0].mxu0 %v1186_v2  ;;  %2462 = vmatpush3.bf16.msra.mxu1 %v2869_v42  ;;  %v637_v25 = vsel %vm620_vm15, %v628_v21, %v3731_v15  ;;  %v644_v42 = vrot.slane %v642_v32, 2  ;;  %v1324_v43 = vrot.slane %v1322_v35, 4  ;;  %v1045_v4 = vrot.slane %v3709_v50, 3 }
  0xfb   : > { %2562 = vmatpush3.bf16.msra.mxu0 %v2870_v44  ;;  %2463 = vmatprep.subr.bf16.mxu1 %v2871_v59  ;;  %v1327_v44 = vrot.slane %v1325_v37, 5  ;;  %v772_v57 = vor.u32 %v771_v47, %v768_v46  ;;  %v1050_v12 = vshrl.u32 %v3720_v58, 16  ;;  %v1053_v13 = vshll.u32 %v3720_v58, 16 }
  0xfc   : > { %2563 = vmatprep.subr.bf16.mxu0 %v2872_v60  ;;  %2577 = vmatprep.mubr.bf16.mxu0 %v1320_v24  ;;  %v645_v49 = vor.u32 %v644_v42, %v641_v41  ;;  %v3768_v8 = vor.u32 %v1046_v6, %v1045_v4  ;;  %v778_v21 = vshrl.u32 %v3772_v16, 16  ;;  %v781_v58 = vshll.u32 %v3772_v16, 16  ;;  %v2898_v24 = vld [vmem:[#allocation11 + $0x1f0] sm:$0xff]   ;;  %v3789_v42 = vld [vmem:[#allocation2] sm:$0xf8] }
  0xfd   : > { %2477 = vmatprep.mubr.bf16.mxu1 %v637_v25  ;;  %v1328_v54 = vor.u32 %v1327_v44, %v1324_v43  ;;  %v1052_v17 = vrot.slane %v1050_v12, 3  ;;  %v1862_v25 = vrot.slane %v3712_v51, 7  ;;  %v1457_v31 = vrot.slane %v3741_v30, 5  ;;  %v2902_v43 = vld [vmem:[#allocation11 + $0x200] sm:$0xff]  }
  0xfe   : > { %2464 = vmatpush3.bf16.msra.mxu1 %v2871_v59  ;;  %v3753_v59 = vor.u32 %v774_v52, %v773_v48  ;;  %v646_v62 = vsel %vm620_vm15, %v3731_v15, %v645_v49  ;;  %v2895_v15 = vld [vmem:[#allocation11 + $0xa8] sm:$0xff]   ;;  %v1590_v30 = vrot.slane %v3712_v51, 6  ;;  %v910_v44 = vrot.slane %v3789_v42, 3 }
  0xff   : > { %2564 = vmatpush3.bf16.msra.mxu0 %v2872_v60  ;;  %2465 = vmatprep.subr.bf16.mxu1 %v2873_v7  ;;  %v1454_v60 = vrot.slane %v3751_v55, 5  ;;  %v1329_v63 = vsel %vm1308_vm14, %v3735_v18, %v1328_v54  ;;  %v1055_v18 = vrot.slane %v1053_v13, 4  ;;  %v1458_v51 = vsel %vm1453_vm3, %v1455_v61, %v1457_v31  ;;  %v2903_v48 = vld [vmem:[#allocation11 + $0xc8] sm:$0xff]   ;;  %v2905_v54 = vld [vmem:[#allocation11 + $0xd0] sm:$0xff]   ;;  %v2926_v31 = vld [vmem:[#allocation11 + $0x260] sm:$0xff]  }
 0x100   : > { %2565 = vmatprep.subr.bf16.mxu0 %v2874_v11  ;;  %v776_v2 = vsel %vm764_vm2, %v772_v57, %v3753_v59  ;;  %v2904_v52 = vld [vmem:[#allocation11 + $0x208] sm:$0xff]   ;;  %v2908_v57 = vld [vmem:[#allocation11 + $0x218] sm:$0xff]   ;;  %v1038_v4 = vshrl.u32 %v3789_v42, 16  ;;  %v913_v13 = vrot.slane %v3772_v16, 3 }
 0x101   : > { %v1456_v3 = vsel %vm1453_vm3, %v1454_v60, %v1455_v61  ;;  %v1056_v22 = vor.u32 %v1055_v18, %v1052_v17  ;;  %v2910_v60 = vld [vmem:[#allocation11 + $0x220] sm:$0xff]   ;;  %v2911_v61 = vld [vmem:[#allocation11 + $0xe8] sm:$0xff]  }
 0x102   : > { %2466 = vmatpush3.bf16.msra.mxu1 %v2873_v7  ;;  %v2890_v7 = vld [vmem:[#allocation11 + $0x1d0] sm:$0xff]   ;;  %v2917_v17 = vld [vmem:[#allocation11 + $0x100] sm:$0xff]   ;;  %v2919_v16 = vld [vmem:[#allocation11 + $0x108] sm:$0xff]  }
 0x103   : > { %2566 = vmatpush3.bf16.msra.mxu0 %v2874_v11  ;;  %2467 = vmatprep.subr.bf16.mxu1 %v2875_v20  ;;  %v2893_v11 = vld [vmem:[#allocation11 + $0xa0] sm:$0xff]   ;;  %v3785_v35 = vsel %vm1036_vm4, %v3768_v8, %v1056_v22 }
 0x104   : > { %2567 = vmatprep.subr.bf16.mxu0 %v2876_v23  ;;  %v2918_v18 = vld [vmem:[#allocation11 + $0x240] sm:$0xff]  }
 0x106   : > { %2468 = vmatpush3.bf16.msra.mxu1 %v2875_v20  ;;  %v2897_v20 = vld [vmem:[#allocation11 + $0xb0] sm:$0xff]  }
 0x107   : > { %2568 = vmatpush3.bf16.msra.mxu0 %v2876_v23  ;;  %2469 = vmatprep.subr.bf16.mxu1 %v2877_v26  ;;  %v1861_v23 = vrot.slane %v3709_v50, 6 }
 0x108   : > { %2569 = vmatprep.subr.bf16.mxu0 %v2878_v27 }
 0x109   : > { %v3781_v32 = vor.u32 %v1862_v25, %v1861_v23  ;;  %v2920_v23 = vld [vmem:[#allocation11 + $0x248] sm:$0xff]  }
 0x10a   : > { %2470 = vmatpush3.bf16.msra.mxu1 %v2877_v26  ;;  %v1582_v26 = vshrl.u32 %v3751_v55, 16 }
 0x10b   : > { %2570 = vmatpush3.bf16.msra.mxu0 %v2878_v27  ;;  %2471 = vmatprep.subr.bf16.mxu1 %v2879_v28  ;;  %v1585_v27 = vshll.u32 %v3751_v55, 16  ;;  %v2906_v55 = vld [vmem:[#allocation11 + $0x210] sm:$0xff]  }
 0x10c   : > { %2571 = vmatprep.subr.bf16.mxu0 %v2880_v29  ;;  %v1584_v37 = vrot.slane %v1582_v26, 5  ;;  %v2921_v26 = vld [vmem:[#allocation11 + $0x110] sm:$0xff]  }
 0x10d   : > { %v1587_v38 = vrot.slane %v1585_v27, 6  ;;  %v2922_v27 = vld [vmem:[#allocation11 + $0x250] sm:$0xff]  }
 0x10e   : > { %2472 = vmatpush3.bf16.msra.mxu1 %v2879_v28  ;;  %v2899_v28 = vld [vmem:[#allocation11 + $0xb8] sm:$0xff]  }
 0x10f   : > { %2572 = vmatpush3.bf16.msra.mxu0 %v2880_v29  ;;  %2473 = vmatprep.subr.bf16.mxu1 %v2881_v33  ;;  %v2900_v29 = vld [vmem:[#allocation11 + $0x1f8] sm:$0xff]   ;;  %v1588_v46 = vor.u32 %v1587_v38, %v1584_v37  ;;  %v2929_v37 = vld [vmem:[#allocation11 + $0x130] sm:$0xff]  }
 0x110   : > { %2573 = vmatprep.subr.bf16.mxu0 %v2882_v34  ;;  %v2930_v38 = vld [vmem:[#allocation11 + $0x270] sm:$0xff]  }
 0x112   : > { %2474 = vmatpush3.bf16.msra.mxu1 %v2881_v33  ;;  %v780_v33 = vrot.slane %v778_v21, 2  ;;  %v1727_v21 = vrot.slane %v3701_v36, 6 }
 0x113   : > { %2574 = vmatpush3.bf16.msra.mxu0 %v2882_v34  ;;  %2475 = vmatprep.subr.bf16.mxu1 %v2883_v40  ;;  %v783_v34 = vrot.slane %v781_v58, 3 }
 0x114   : > { %2575 = vmatprep.subr.bf16.mxu0 %v2884_v45 }
 0x115   : > { %v784_v41 = vor.u32 %v783_v34, %v780_v33  ;;  %v2927_v33 = vld [vmem:[#allocation11 + $0x128] sm:$0xff]  }
 0x116   : > { %2476 = vmatpush3.bf16.msra.mxu1 %v2883_v40  ;;  %v1589_v40 = vrot.slane %v3709_v50, 5  ;;  %v2928_v34 = vld [vmem:[#allocation11 + $0x268] sm:$0xff]  }
 0x117   : > { %2576 = vmatpush3.bf16.msra.mxu0 %v2884_v45  ;;  %2481 = vmatprep.subr.bf16.mxu1 %v2885_v53  ;;  %v911_v45 = vrot.slane %v3701_v36, 3  ;;  %v785_v50 = vsel %vm764_vm2, %v3753_v59, %v784_v41  ;;  %v2909_v59 = vld [vmem:[#allocation11 + $0xe0] sm:$0xff]   ;;  %v2932_v41 = vld [vmem:[#allocation11 + $0x278] sm:$0xff]  }
 0x118   : > { %2581 = vmatprep.subr.bf16.mxu0 %v2886_v56  ;;  %v3793_v47 = vor.u32 %v1590_v30, %v1589_v40  ;;  %v2931_v30 = vld [vmem:[#allocation11 + $0x138] sm:$0xff]   ;;  %v2937_v36 = vld [vmem:[#allocation11 + $0x2a0] sm:$0xff]  }
 0x119   : > { %2478 = vmatmul.mubr.bf16.vlgmr.msra.gmra.mrb[0].mxu1 %v646_v62  ;;  %v2912_v62 = vld [vmem:[#allocation11 + $0x228] sm:$0xff]   ;;  %v914_v58 = vsel %vm909_vm5, %v911_v45, %v913_v13 }
 0x11a   : > { %2578 = vmatmul.mubr.bf16.vlgmr.msra.gmra.mrb[0].mxu0 %v1329_v63  ;;  %2482 = vmatpush3.bf16.msra.mxu1 %v2885_v53  ;;  %v912_v53 = vsel %vm909_vm5, %v910_v44, %v911_v45  ;;  %v1592_v49 = vsel %vm1580_vm6, %v1588_v46, %v3793_v47  ;;  %v3805_v63 = vld [vmem:[#allocation2 + $0x10] sm:$0x3f]  ;;  %v2933_v45 = vld [vmem:[#allocation11 + $0x280] sm:$0xff]  }
 0x11b   : > { %2582 = vmatpush3.bf16.msra.mxu0 %v2886_v56  ;;  %2483 = vmatprep.subr.bf16.mxu1 %v2887_v0  ;;  %v2907_v56 = vld [vmem:[#allocation11 + $0xd8] sm:$0xff]   ;;  %v1729_v44 = vrot.slane %v3805_v63, 6 }
 0x11c   : > { %2583 = vmatprep.subr.bf16.mxu0 %v2888_v1  ;;  %2497 = vmatprep.mubr.bf16.mxu1 %v776_v2  ;;  %v2913_v2 = vld [vmem:[#allocation11 + $0xf0] sm:$0xff]  }
 0x11d   : > { %2597 = vmatprep.mubr.bf16.mxu0 %v1456_v3  ;;  %v2914_v3 = vld [vmem:[#allocation11 + $0x230] sm:$0xff]  }
 0x11e   : > { %2484 = vmatpush3.bf16.msra.mxu1 %v2887_v0  ;;  %v1594_v0 = vshrl.u32 %v3805_v63, 16 }
 0x11f   : > { %2584 = vmatpush3.bf16.msra.mxu0 %v2888_v1  ;;  %2485 = vmatprep.subr.bf16.mxu1 %v2889_v5  ;;  %v1597_v1 = vshll.u32 %v3805_v63, 16 }
 0x120   : > { %2585 = vmatprep.subr.bf16.mxu0 %v2890_v7  ;;  %v1596_v6 = vrot.slane %v1594_v0, 5 }
 0x122   : > { %2486 = vmatpush3.bf16.msra.mxu1 %v2889_v5  ;;  %v1041_v5 = vshll.u32 %v3789_v42, 16 }
 0x123   : > { %2586 = vmatpush3.bf16.msra.mxu0 %v2890_v7  ;;  %2487 = vmatprep.subr.bf16.mxu1 %v2891_v9  ;;  %v1599_v7 = vrot.slane %v1597_v1, 6 }
 0x124   : > { %2587 = vmatprep.subr.bf16.mxu0 %v2892_v10  ;;  %v1043_v12 = vrot.slane %v1041_v5, 4 }
 0x126   : > { %2488 = vmatpush3.bf16.msra.mxu1 %v2891_v9  ;;  %v2915_v9 = vld [vmem:[#allocation11 + $0xf8] sm:$0xff]  }
 0x127   : > { %2588 = vmatpush3.bf16.msra.mxu0 %v2892_v10  ;;  %2489 = vmatprep.subr.bf16.mxu1 %v2893_v11  ;;  %v2916_v10 = vld [vmem:[#allocation11 + $0x238] sm:$0xff]  }
 0x128   : > { %2589 = vmatprep.subr.bf16.mxu0 %v2894_v14 }
 0x12a   : > { %2490 = vmatpush3.bf16.msra.mxu1 %v2893_v11  ;;  %v1040_v11 = vrot.slane %v1038_v4, 3 }
 0x12b   : > { %2590 = vmatpush3.bf16.msra.mxu0 %v2894_v14  ;;  %2491 = vmatprep.subr.bf16.mxu1 %v2895_v15  ;;  %v1600_v14 = vor.u32 %v1599_v7, %v1596_v6 }
 0x12c   : > { %2591 = vmatprep.subr.bf16.mxu0 %v2896_v19 }
 0x12d   : > { %v1601_v22 = vsel %vm1580_vm6, %v3793_v47, %v1600_v14  ;;  %v1730_v47 = vsel %vm1725_vm7, %v1727_v21, %v1729_v44 }
 0x12e   : > { %2492 = vmatpush3.bf16.msra.mxu1 %v2895_v15  ;;  %v1705_v15 = vld [vmem:[#allocation2] sm:$0xc0] }
 0x12f   : > { %2592 = vmatpush3.bf16.msra.mxu0 %v2896_v19  ;;  %2493 = vmatprep.subr.bf16.mxu1 %v2897_v20  ;;  %v1044_v19 = vor.u32 %v1043_v12, %v1040_v11  ;;  %v1857_v40 = vshll.u32 %v1705_v15, 16 }
 0x130   : > { %2593 = vmatprep.subr.bf16.mxu0 %v2898_v24 }
 0x132   : > { %2494 = vmatpush3.bf16.msra.mxu1 %v2897_v20  ;;  %v1726_v20 = vrot.slane %v1705_v15, 6 }
 0x133   : > { %2594 = vmatpush3.bf16.msra.mxu0 %v2898_v24  ;;  %2495 = vmatprep.subr.bf16.mxu1 %v2899_v28  ;;  %v1048_v24 = vsel %vm1036_vm4, %v1044_v19, %v3768_v8  ;;  %v2925_v8 = vld [vmem:[#allocation11 + $0x120] sm:$0xff]  }
 0x134   : > { %2595 = vmatprep.subr.bf16.mxu0 %v2900_v29  ;;  %v1728_v25 = vsel %vm1725_vm7, %v1726_v20, %v1727_v21 }
 0x136   : > { %2496 = vmatpush3.bf16.msra.mxu1 %v2899_v28  ;;  %v2923_v28 = vld [vmem:[#allocation11 + $0x118] sm:$0xff]  }
 0x137   : > { %2596 = vmatpush3.bf16.msra.mxu0 %v2900_v29  ;;  %2501 = vmatprep.subr.bf16.mxu1 %v2901_v39  ;;  %v2924_v29 = vld [vmem:[#allocation11 + $0x258] sm:$0xff]  }
 0x138   : > { %2601 = vmatprep.subr.bf16.mxu0 %v2902_v43 }
 0x139   : > { %2498 = vmatmul.mubr.bf16.vlgmr.msra.gmra.mrb[0].mxu1 %v785_v50  ;;  %v2934_v50 = vld [vmem:[#allocation11 + $0x288] sm:$0xff]  }
 0x13a   : > { %2598 = vmatmul.mubr.bf16.vlgmr.msra.gmra.mrb[0].mxu0 %v1458_v51  ;;  %2502 = vmatpush3.bf16.msra.mxu1 %v2901_v39  ;;  %v1854_v39 = vshrl.u32 %v1705_v15, 16 }
 0x13b   : > { %2602 = vmatpush3.bf16.msra.mxu0 %v2902_v43  ;;  %2503 = vmatprep.subr.bf16.mxu1 %v2903_v48  ;;  %v1859_v43 = vrot.slane %v1857_v40, 7 }
 0x13c   : > { %2603 = vmatprep.subr.bf16.mxu0 %v2904_v52  ;;  %2517 = vmatprep.mubr.bf16.mxu1 %v912_v53  ;;  %v1856_v42 = vrot.slane %v1854_v39, 6  ;;  %v2938_v53 = vld [vmem:[#allocation11 + $0x2a8] sm:$0xff]  }
 0x13d   : > { %2617 = vmatprep.mubr.bf16.mxu0 %v1592_v49  ;;  %v1834_v49 = vld [vmem:[#allocation2 + $0x10] sm:$0x7f] }
 0x13e   : > { %2504 = vmatpush3.bf16.msra.mxu1 %v2903_v48  ;;  %v1860_v46 = vor.u32 %v1859_v43, %v1856_v42  ;;  %v2935_v48 = vld [vmem:[#allocation11 + $0x290] sm:$0xff]  }
 0x13f   : > { %2604 = vmatpush3.bf16.msra.mxu0 %v2904_v52  ;;  %2505 = vmatprep.subr.bf16.mxu1 %v2905_v54  ;;  %v2936_v52 = vld [vmem:[#allocation11 + $0x298] sm:$0xff]  }
 0x140   : > { %2605 = vmatprep.subr.bf16.mxu0 %v2906_v55  ;;  %v1864_v51 = vsel %vm1852_vm8, %v1860_v46, %v3781_v32 }
 0x142   : > { %2506 = vmatpush3.bf16.msra.mxu1 %v2905_v54  ;;  %v1866_v54 = vshrl.u32 %v1834_v49, 16 }
 0x143   : > { %2606 = vmatpush3.bf16.msra.mxu0 %v2906_v55  ;;  %2507 = vmatprep.subr.bf16.mxu1 %v2907_v56  ;;  %v1869_v55 = vshll.u32 %v1834_v49, 16 }
 0x144   : > { %2607 = vmatprep.subr.bf16.mxu0 %v2908_v57 }
 0x146   : > { %2508 = vmatpush3.bf16.msra.mxu1 %v2907_v56  ;;  %v1868_v56 = vrot.slane %v1866_v54, 6 }
 0x147   : > { %2608 = vmatpush3.bf16.msra.mxu0 %v2908_v57  ;;  %2509 = vmatprep.subr.bf16.mxu1 %v2909_v59  ;;  %v1871_v57 = vrot.slane %v1869_v55, 7 }
 0x148   : > { %2609 = vmatprep.subr.bf16.mxu0 %v2910_v60 }
 0x14a   : > { %2510 = vmatpush3.bf16.msra.mxu1 %v2909_v59  ;;  %v2940_v59 = vld [vmem:[#allocation11 + $0x2b8] sm:$0xff]  }
 0x14b   : > { %2610 = vmatpush3.bf16.msra.mxu0 %v2910_v60  ;;  %2511 = vmatprep.subr.bf16.mxu1 %v2911_v61  ;;  %v1872_v60 = vor.u32 %v1871_v57, %v1868_v56 }
 0x14c   : > { %2611 = vmatprep.subr.bf16.mxu0 %v2912_v62 }
 0x14e   : > { %2512 = vmatpush3.bf16.msra.mxu1 %v2911_v61  ;;  %v1873_v61 = vsel %vm1852_vm8, %v3781_v32, %v1872_v60 }
 0x14f   : > { %2612 = vmatpush3.bf16.msra.mxu0 %v2912_v62  ;;  %2513 = vmatprep.subr.bf16.mxu1 %v2913_v2 }
 0x150   : > { %2613 = vmatprep.subr.bf16.mxu0 %v2914_v3 }
 0x152   : > { %2514 = vmatpush3.bf16.msra.mxu1 %v2913_v2 }
 0x153   : > { %2614 = vmatpush3.bf16.msra.mxu0 %v2914_v3  ;;  %2515 = vmatprep.subr.bf16.mxu1 %v2915_v9  ;;  %v2299_v3 = vld [vmem:[%s4000_s16] ss:$0 sm:$0xff] }
 0x154   : > { %2615 = vmatprep.subr.bf16.mxu0 %v2916_v10 }
 0x156   : > { %2516 = vmatpush3.bf16.msra.mxu1 %v2915_v9 }
 0x157   : > { %2616 = vmatpush3.bf16.msra.mxu0 %v2916_v10  ;;  %2521 = vmatprep.subr.bf16.mxu1 %v2917_v17 }
 0x158   : > { %2621 = vmatprep.subr.bf16.mxu0 %v2918_v18 }
 0x159   : > { %2518 = vmatmul.mubr.bf16.vlgmr.msra.gmra.mrb[0].mxu1 %v914_v58 }
 0x15a   : > { %2618 = vmatmul.mubr.bf16.vlgmr.msra.gmra.mrb[0].mxu0 %v1601_v22  ;;  %2522 = vmatpush3.bf16.msra.mxu1 %v2917_v17 }
 0x15b   : > { %2622 = vmatpush3.bf16.msra.mxu0 %v2918_v18  ;;  %2523 = vmatprep.subr.bf16.mxu1 %v2919_v16 }
 0x15c   : > { %2623 = vmatprep.subr.bf16.mxu0 %v2920_v23  ;;  %2537 = vmatprep.mubr.bf16.mxu1 %v1048_v24 }
 0x15d   : > { %2637 = vmatprep.mubr.bf16.mxu0 %v1728_v25 }
 0x15e   : > { %2524 = vmatpush3.bf16.msra.mxu1 %v2919_v16 }
 0x15f   : > { %2624 = vmatpush3.bf16.msra.mxu0 %v2920_v23  ;;  %2525 = vmatprep.subr.bf16.mxu1 %v2921_v26 }
 0x160   : > { %2625 = vmatprep.subr.bf16.mxu0 %v2922_v27 }
 0x162   : > { %2526 = vmatpush3.bf16.msra.mxu1 %v2921_v26 }
 0x163   : > { %2626 = vmatpush3.bf16.msra.mxu0 %v2922_v27  ;;  %2527 = vmatprep.subr.bf16.mxu1 %v2923_v28 }
 0x164   : > { %2627 = vmatprep.subr.bf16.mxu0 %v2924_v29 }
 0x166   : > { %2528 = vmatpush3.bf16.msra.mxu1 %v2923_v28 }
 0x167   : > { %2628 = vmatpush3.bf16.msra.mxu0 %v2924_v29  ;;  %2529 = vmatprep.subr.bf16.mxu1 %v2925_v8 }
 0x168   : > { %2629 = vmatprep.subr.bf16.mxu0 %v2926_v31 }
 0x16a   : > { %2530 = vmatpush3.bf16.msra.mxu1 %v2925_v8 }
 0x16b   : > { %2630 = vmatpush3.bf16.msra.mxu0 %v2926_v31  ;;  %2531 = vmatprep.subr.bf16.mxu1 %v2927_v33 }
 0x16c   : > { %2631 = vmatprep.subr.bf16.mxu0 %v2928_v34 }
 0x16e   : > { %2532 = vmatpush3.bf16.msra.mxu1 %v2927_v33 }
 0x16f   : > { %2632 = vmatpush3.bf16.msra.mxu0 %v2928_v34  ;;  %2533 = vmatprep.subr.bf16.mxu1 %v2929_v37 }
 0x170   : > { %2633 = vmatprep.subr.bf16.mxu0 %v2930_v38 }
 0x172   : > { %2534 = vmatpush3.bf16.msra.mxu1 %v2929_v37 }
 0x173   : > { %2634 = vmatpush3.bf16.msra.mxu0 %v2930_v38  ;;  %2535 = vmatprep.subr.bf16.mxu1 %v2931_v30 }
 0x174   : > { %2635 = vmatprep.subr.bf16.mxu0 %v2932_v41 }
 0x176   : > { %2536 = vmatpush3.bf16.msra.mxu1 %v2931_v30 }
 0x177   : > { %2636 = vmatpush3.bf16.msra.mxu0 %v2932_v41 }
 0x178   : > { %2641 = vmatprep.subr.bf16.mxu0 %v2933_v45 }
 0x179   : > { %2538 = vmatmul.mubr.bf16.vlgmr.msra.gmra.mrb[0].mxu1 %v3785_v35  ;;  %v2939_v35 = vld [vmem:[#allocation11 + $0x2b0] sm:$0xff]  }
 0x17a   : > { %2638 = vmatmul.mubr.bf16.vlgmr.msra.gmra.mrb[0].mxu0 %v1730_v47 }
 0x17b   : > { %2642 = vmatpush3.bf16.msra.mxu0 %v2933_v45  ;;  %2657 = vmatprep.mubr.bf16.mxu0 %v1864_v51 }
 0x17c   : > { %2643 = vmatprep.subr.bf16.mxu0 %v2934_v50 }
 0x17f   : > { %2644 = vmatpush3.bf16.msra.mxu0 %v2934_v50 }
 0x180   : > { %2645 = vmatprep.subr.bf16.mxu0 %v2935_v48 }
 0x183   : > { %2646 = vmatpush3.bf16.msra.mxu0 %v2935_v48 }
 0x184   : > { %2647 = vmatprep.subr.bf16.mxu0 %v2936_v52 }
 0x187   : > { %2648 = vmatpush3.bf16.msra.mxu0 %v2936_v52 }
 0x188   : > { %2649 = vmatprep.subr.bf16.mxu0 %v2937_v36 }
 0x18b   : > { %2650 = vmatpush3.bf16.msra.mxu0 %v2937_v36 }
 0x18c   : > { %2651 = vmatprep.subr.bf16.mxu0 %v2938_v53 }
 0x18f   : > { %2652 = vmatpush3.bf16.msra.mxu0 %v2938_v53 }
 0x190   : > { %2653 = vmatprep.subr.bf16.mxu0 %v2939_v35 }
 0x193   : > { %2654 = vmatpush3.bf16.msra.mxu0 %v2939_v35 }
 0x194   : > { %2655 = vmatprep.subr.bf16.mxu0 %v2940_v59 }
 0x197   : > { %2656 = vmatpush3.bf16.msra.mxu0 %v2940_v59 }
 0x19a   : > { %2658 = vmatmul.mubr.bf16.vlgmr.msra.gmra.mrb[0].mxu0 %v1873_v61 }
 0x24c   : > { %v2539_v62 = vpop.f32.mrb[0].mxu1 }
 0x24d   : > { %v1142_v63 = vpop.f32.mrb[1].mxu1 }
 0x24e   : > { %v2540_v0 = vpop.f32.mrb[2].mxu1 }
 0x24f   : > { %v1145_v1 = vpop.f32.mrb[3].mxu1 }
 0x26d   : > { %v2659_v2 = vpop.f32.mrb[0].mxu0 }
 0x26e   : > { %v2661_v4 = vadd.f32 %v2659_v2, %v2539_v62  ;;  %v1958_v5 = vpop.f32.mrb[1].mxu0 }
 0x26f   : > { %v2662_v6 = vadd.f32 %v1958_v5, %v1142_v63  ;;  %v2660_v7 = vpop.f32.mrb[2].mxu0 }
 0x270   : > { %v1986_v9 = vadd.f32 %v2661_v4, %v2299_v3  ;;  %v2663_v10 = vadd.f32 %v2660_v7, %v2540_v0  ;;  %v1961_v32 = vpop.f32.mrb[3].mxu0 }
 0x271   : > { %v1984_v11 = vadd.f32 %v2662_v6, %v2299_v3  ;;  %v2664_v12 = vadd.f32 %v1961_v32, %v1145_v1 }
 0x272   : > { %v1987_v13 = vadd.f32 %v2663_v10, %v2299_v3  ;;  %v1990_v15 = vmax.f32 %v1986_v9, 0.0 }
 0x273   : > { %v1985_v14 = vadd.f32 %v2664_v12, %v2299_v3  ;;  %v1988_v18 = vmax.f32 %v1984_v11, 0.0 }
 0x274   : > { %v1991_v17 = vmax.f32 %v1987_v13, 0.0 }
 0x275   : > { %v1989_v19 = vmax.f32 %v1985_v14, 0.0 }
 0x276   : > { %v2328_v20 = vpack.c.bf16 %v1991_v17, %v1990_v15 }
 0x277   : > { %v2323_v21 = vpack.c.bf16 %v1989_v19, %v1988_v18 }
 0x278   : > { %2330 = vst [vmem:[%s383_s17 + $0x8] sm:$0xff] %v2328_v20  }
 0x279   : > { %2324 = vst [vmem:[%s383_s17] sm:$0xff] %v2323_v21  }
 0x27a   : > { %3082 = shalt.err (!%p3079_p3)
}
 0x27b   : > { %s3083_s18 = scalar_lea.hbm %s3844_s6, 256  ;;  %s3087_s16 = scalar_lea.hbm %s4001_s2, 1024 }
 0x27c   : > { %p3084_p11 = scmp.ne.s32.totalorder %s3844_s6, %s3083_s18  ;;  %p3088_p1 = scmp.lt.u32.totalorder %s3844_s6, %s4001_s2 }
 0x27d   : > { %p3089_p13 = scmp.lt.u32.totalorder %s3087_s16, %s3083_s18  ;;  %p3091_p12 = scmp.lt.u32.totalorder %s3083_s18, %s3844_s6 }
 0x27e   : > { %p3085_p4 = pnand %p3084_p11, %p4002_p2 }
 0x27f   : > { %p3090_p8 = por %p3089_p13, %p3088_p1 }
 0x280   : > { %p3086_p7 = pneg %p3085_p4 }
 0x281   : > { %p3092_p9 = por %p3091_p12, %p3090_p8 }
 0x283   : > { %p3093_p5 = pnand %p3092_p9, %p3086_p7 }
 0x285   : > { %3096 = shalt.err (!%p3093_p5)
}
 0x286   : > { %s3239_s7 = smov 64   ;;  %s3240_s17 = smov 4  }
 0x287   : > { %2711 = dma.vmem_to_hbm [thread:$0]  (%p4002_p2), %s3839_s27, 256, %s3844_s6, %s2013_s26, %s3239_s7, %s3239_s7, %s3240_s17  }
 0x288 PF: > { %p2734_p6 = scmp.ge.s32.totalorder %s3229_s19, 2  ;;  %s2043_s23 = sand.u32 1, %s3201_s12  }
 0x289   : > { %p4003_p10 = scmp.ne.s32.totalorder %s3978_s15, 0  ;;  %s2044_s22 = scalar_lea.sflag [#allocation7], %s2043_s23 }
 0x28b   : > { %p2728_p0 = pnand %p2734_p6, %p4003_p10 }
 0x28d   : > { %3172 = dma.done.wait (!%p2728_p0), %s2044_s22, 256  }
 0x28e   : > { %3174 = vsyncadd (!%p2728_p0), %s2044_s22, 4294967040  ;;  %s30_s19 = sadd.s32 1, %s3229_s19   ;;  %s4005_s29 = sld [smem:[#allocation20_spill]] }
 0x28f   : > { %p3875_p3 = scmp.ge.s32.totalorder %s30_s19, 6   ;;  %s4006_s21 = sld [smem:[#allocation28_spill]] }
 0x290   : > { %s4007_s27 = sld [smem:[#allocation29_spill]]  ;;  %s4008_s15 = sld [smem:[#allocation23_spill]] }
 0x291   : > { %s4009_s16 = sld [smem:[#allocation24_spill]]  ;;  %s4010_s17 = sld [smem:[#allocation25_spill]] }
 0x292   : > { %s4011_s18 = sld [smem:[#allocation26_spill]]  ;;  %s4013_s7 = smov %s3181_s8 }
 0x293   : > { %s4014_s8 = smov %s3185_s9  ;;  %s4015_s9 = smov %s3597_s25 }
 0x294   : > { %s4016_s10 = smov %s4005_s29  ;;  %s4017_s11 = smov %s3197_s0 }
 0x295   : > { %s4018_s0 = smov %s4006_s21  ;;  %s4019_s12 = smov %s3205_s13 }
 0x296   : > { %s4020_s13 = smov %s3209_s14  ;;  %s4021_s14 = smov %s4007_s27 }
 0x297   :  { %29 = sbr.rel (!%p3875_p3) target bundleno = 26 (0x1a), region = 123 }
 0x29e   :  { %2049 = vsyncpa [#allocation6], 1 }
 0x29f   :  { %2051 = vsyncpa [#allocation6 + $0x1], 1 }
 0x2a0   :  { %2052 = vsyncpa [#allocation9], 1 }
 0x2a1   :  { %2054 = vsyncpa [#allocation9 + $0x1], 1 }
 0x2a2   :  { %2055 = vsyncpa [#allocation12], 1 }
 0x2a3   :  { %2056 = vsyncpa [#allocation7], 1 }
 0x2a4   :  { %2058 = vsyncpa [#allocation7 + $0x1], 1 }

</bundles_post_ra>
